<compile_context>
chip_gen: v5e
topology: v5e:2x2
jax: 0.10.0
libtpu: 0.0.40
codegen_flags: <defaults>
</compile_context>

<pallas_src>
import functools

import jax
import jax.numpy as jnp
import numpy as np
from jax import lax
from jax.experimental import pallas as pl
from jax.experimental.pallas import tpu as pltpu


def lstm_fc_kernel(x_ref, wih_ref, whh_ref, b_ref, wfc_ref, bfc_ref,
                   out_ref, gx_ref, *, seq_len, batch_tile, unroll):
    """Whole-sequence LSTM + FC head for one batch tile.

    x_ref  : (S*Bt, I)   bf16  time-major rows (t*Bt + b), one batch tile
    wih_ref: (I, 4Hp)    bf16  W_ih^T, gate-blocked & lane-padded (i,f,g,o)
    whh_ref: (Hp, 4Hp)   bf16  W_hh^T, gate-blocked & lane-padded
    b_ref  : (1, 4Hp)    f32   b_ih + b_hh, lane-padded
    wfc_ref: (Hp, Cp)    bf16  W_fc^T, lane-padded
    bfc_ref: (1, Cp)     f32
    out_ref: (Bt, Cp)    f32
    gx_ref : (S*Bt, 4Hp) f32   VMEM scratch for the hoisted input projection
    """
    Hp = whh_ref.shape[0]

    # ---- Hoisted input projection: one well-shaped MXU matmul + bias, done once.
    gx_ref[...] = (jnp.dot(x_ref[...], wih_ref[...],
                           preferred_element_type=jnp.float32)
                   + b_ref[...])

    # Loop-invariant: recurrent weights loaded once.
    whh = whh_ref[...]                       # (Hp, 4Hp)
    rdt = whh.dtype

    def step(t, carry):
        h, c = carry                         # (Bt, Hp) f32 each
        row = pl.multiple_of(t * batch_tile, batch_tile)
        gates = (gx_ref[pl.ds(row, batch_tile), :]
                 + jnp.dot(h.astype(rdt), whh,
                           preferred_element_type=jnp.float32))    # (Bt, 4Hp) f32
        # Lane-aligned per-gate slices (Hp % 128 == 0): minimal EUP traffic,
        # no cross-lane shuffles on the serial path.
        i_g = jax.nn.sigmoid(gates[:, 0 * Hp:1 * Hp])
        f_g = jax.nn.sigmoid(gates[:, 1 * Hp:2 * Hp])
        g_g = jnp.tanh(gates[:, 2 * Hp:3 * Hp])
        o_g = jax.nn.sigmoid(gates[:, 3 * Hp:4 * Hp])
        c_new = f_g * c + i_g * g_g
        h_new = o_g * jnp.tanh(c_new)
        return h_new, c_new

    h0 = jnp.zeros((batch_tile, Hp), jnp.float32)
    c0 = jnp.zeros((batch_tile, Hp), jnp.float32)
    h_last, _ = lax.fori_loop(0, seq_len, step, (h0, c0), unroll=unroll)

    # Linear head on the last hidden state; lane-dense (Cp % 128 == 0) store.
    out_ref[...] = (jnp.dot(h_last.astype(wfc_ref.dtype), wfc_ref[...],
                            preferred_element_type=jnp.float32)
                    + bfc_ref[...]).astype(out_ref.dtype)


def _pad_gate_rows(w, H, Hp):
    """(4H, D) -> (4Hp, D): gate k's rows land at [k*Hp, k*Hp + H); rest zero."""
    out = jnp.zeros((4 * Hp, w.shape[1]), w.dtype)
    for k in range(4):
        out = out.at[k * Hp:k * Hp + H, :].set(w[k * H:(k + 1) * H, :])
    return out


def model_forward(x, params, *, matmul_dtype=jnp.bfloat16):
    """x: (batch, seq, input) float32. Returns (batch, n_class) float32.

    Precision contract: matmul operands (x, h, weights) are cast to `matmul_dtype`
    (default bf16, native MXU rate); accumulation, biases, gates and the recurrent
    state are float32. Pass matmul_dtype=jnp.float32 for a full-f32 fallback.
    """
    w_ih, w_hh = params["w_ih"], params["w_hh"]
    b_ih, b_hh = params["b_ih"], params["b_hh"]
    w_fc, b_fc = params["w_fc"], params["b_fc"]

    B, S, I = x.shape
    H = w_hh.shape[1]
    C = w_fc.shape[0]

    Hp = ((H + 127) // 128) * 128            # lane-align hidden/gate blocks
    Cp = ((C + 127) // 128) * 128            # lane-dense output store

    # Batch: pad to the sublane quantum; tile it as a "parallel" grid axis.
    B_pad = max(8, ((B + 7) // 8) * 8)
    if B_pad > 128:
        Bt = 128
        B_pad = ((B_pad + 127) // 128) * 128
    else:
        Bt = B_pad
    n_tiles = B_pad // Bt

    # ---- Weight / bias packing (gate-blocked, lane-padded), done once in XLA.
    wih_t = _pad_gate_rows(w_ih, H, Hp).T.astype(matmul_dtype)          # (I, 4Hp)
    w_hh_cols = jnp.zeros((4 * H, Hp), w_hh.dtype).at[:, :H].set(w_hh)
    whh_t = _pad_gate_rows(w_hh_cols, H, Hp).T.astype(matmul_dtype)     # (Hp, 4Hp)
    b_sum = (b_ih + b_hh).astype(jnp.float32)
    bias_row = _pad_gate_rows(b_sum[:, None], H, Hp).T                  # (1, 4Hp) f32
    wfc_t = jnp.zeros((Hp, Cp), matmul_dtype).at[:H, :C].set(
        w_fc.T.astype(matmul_dtype))                                    # (Hp, Cp)
    bfc = jnp.zeros((1, Cp), jnp.float32).at[:, :C].set(b_fc.reshape(1, C))

    # ---- Input: time-major, batch-padded, grouped by batch tile.
    x_tm = jnp.transpose(x, (1, 0, 2)).astype(matmul_dtype)             # (S, B, I)
    x_pad = jnp.zeros((S, B_pad, I), matmul_dtype).at[:, :B, :].set(x_tm)
    x_tiles = (x_pad.reshape(S, n_tiles, Bt, I)
               .transpose(1, 0, 2, 3)
               .reshape(n_tiles, S * Bt, I))                            # (n, S*Bt, I)

    # ---- Explicit VMEM budget (double-buffered inputs/outputs + scratch).
    msize = jnp.dtype(matmul_dtype).itemsize
    vmem_est = (2 * S * Bt * I * msize
                + 2 * I * 4 * Hp * msize
                + 2 * Hp * 4 * Hp * msize
                + 2 * 4 * Hp * 4
                + 2 * Hp * Cp * msize
                + 2 * Cp * 4
                + 2 * Bt * Cp * 4
                + S * Bt * 4 * Hp * 4)
    vmem_limit = int(min(max(4 * vmem_est, 16 * 2 ** 20), 48 * 2 ** 20))

    kernel = functools.partial(lstm_fc_kernel, seq_len=S, batch_tile=Bt,
                               unroll=min(S, 8))

    out_padded = pl.pallas_call(
        kernel,
        out_shape=jax.ShapeDtypeStruct((B_pad, Cp), jnp.float32),
        grid_spec=pltpu.PrefetchScalarGridSpec(
            num_scalar_prefetch=0,
            grid=(n_tiles,),
            in_specs=[
                pl.BlockSpec((None, S * Bt, I), lambda n: (n, 0, 0)),
                pl.BlockSpec((I, 4 * Hp), lambda n: (0, 0)),
                pl.BlockSpec((Hp, 4 * Hp), lambda n: (0, 0)),
                pl.BlockSpec((1, 4 * Hp), lambda n: (0, 0)),
                pl.BlockSpec((Hp, Cp), lambda n: (0, 0)),
                pl.BlockSpec((1, Cp), lambda n: (0, 0)),
            ],
            out_specs=pl.BlockSpec((Bt, Cp), lambda n: (n, 0)),
            scratch_shapes=[pltpu.VMEM((S * Bt, 4 * Hp), jnp.float32)],
        ),
        compiler_params=pltpu.CompilerParams(
            dimension_semantics=("parallel",),
            vmem_limit_bytes=vmem_limit,
        ),
    )(x_tiles, wih_t, whh_t, bias_row, wfc_t, bfc)

    return out_padded[:B, :C]


def reference_forward(x, params, matmul_dtype=jnp.float32):
    """Pure-JAX reference (torch.nn.LSTM + Linear on last timestep).

    matmul_dtype lets us mirror the kernel's bf16-operand / f32-accumulate scheme
    for a tight apples-to-apples comparison.
    """
    w_ih, w_hh = params["w_ih"], params["w_hh"]
    b_ih, b_hh = params["b_ih"], params["b_hh"]
    w_fc, b_fc = params["w_fc"], params["b_fc"]
    B, S, I = x.shape
    H = w_hh.shape[1]

    b = (b_ih + b_hh).astype(jnp.float32)
    wih_t = w_ih.T.astype(matmul_dtype)
    whh_t = w_hh.T.astype(matmul_dtype)
    wfc_t = w_fc.T.astype(matmul_dtype)
    xs = jnp.transpose(x, (1, 0, 2)).astype(matmul_dtype)

    def step(carry, x_t):
        h, c = carry
        gates = (jnp.dot(x_t, wih_t, preferred_element_type=jnp.float32)
                 + jnp.dot(h.astype(matmul_dtype), whh_t,
                           preferred_element_type=jnp.float32)
                 + b)
        i = jax.nn.sigmoid(gates[:, 0 * H:1 * H])
        f = jax.nn.sigmoid(gates[:, 1 * H:2 * H])
        g = jnp.tanh(gates[:, 2 * H:3 * H])
        o = jax.nn.sigmoid(gates[:, 3 * H:4 * H])
        c = f * c + i * g
        h = o * jnp.tanh(c)
        return (h, c), None

    init = (jnp.zeros((B, H), jnp.float32), jnp.zeros((B, H), jnp.float32))
    (h_last, _), _ = lax.scan(step, init, xs)
    return (jnp.dot(h_last.astype(matmul_dtype), wfc_t,
                    preferred_element_type=jnp.float32) + b_fc)


if __name__ == "__main__":
    # Small shapes consistent with the module: LSTM(input_size, hid_size) + Linear(hid_size, n_class)
    B, S, I, H, C = 2, 8, 16, 32, 4

    key = jax.random.PRNGKey(0)
    kx, k1, k2, k3, k4, k5, k6 = jax.random.split(key, 7)

    # Data prep from the original script: x = x / 16.0
    x = jax.random.uniform(kx, (B, S, I), jnp.float32, 0.0, 16.0) / 16.0

    # Deterministic parameter init, matching PyTorch's U(-1/sqrt(H), 1/sqrt(H)) scheme.
    s = 1.0 / np.sqrt(H)
    params = {
        "w_ih": jax.random.uniform(k1, (4 * H, I), jnp.float32, -s, s),
        "w_hh": jax.random.uniform(k2, (4 * H, H), jnp.float32, -s, s),
        "b_ih": jax.random.uniform(k3, (4 * H,), jnp.float32, -s, s),
        "b_hh": jax.random.uniform(k4, (4 * H,), jnp.float32, -s, s),
        "w_fc": jax.random.uniform(k5, (C, H), jnp.float32, -s, s),
        "b_fc": jax.random.uniform(k6, (C,), jnp.float32, -s, s),
    }

    out = jax.block_until_ready(model_forward(x, params))

    # Tight check against a reference using the same bf16-operand / f32-accumulate scheme.
    ref_bf16 = jax.block_until_ready(reference_forward(x, params, jnp.bfloat16))
    np.testing.assert_allclose(np.asarray(out), np.asarray(ref_bf16),
                               atol=2e-4, rtol=2e-4)

    # Looser sanity check against the pure-f32 reference (true module semantics).
    ref_f32 = jax.block_until_ready(reference_forward(x, params, jnp.float32))
    np.testing.assert_allclose(np.asarray(out), np.asarray(ref_f32),
                               atol=5e-2, rtol=5e-2)

    print("KERNEL_OK")
</pallas_src>

<mosaic_0001>
module attributes {stable_mosaic.version = 11 : i64} {
  func.func @lstm_fc_kernel(%arg0: i32, %arg1: memref<1x64x16xbf16, #tpu.memory_space<vmem>>, %arg2: memref<16x512xbf16, #tpu.memory_space<vmem>>, %arg3: memref<128x512xbf16, #tpu.memory_space<vmem>>, %arg4: memref<1x512xf32, #tpu.memory_space<vmem>>, %arg5: memref<128x128xbf16, #tpu.memory_space<vmem>>, %arg6: memref<1x128xf32, #tpu.memory_space<vmem>>, %arg7: memref<8x128xf32, #tpu.memory_space<vmem>>, %arg8: memref<64x512xf32, #tpu.memory_space<vmem>>) attributes {dimension_semantics = [#tpu.dimension_semantics<parallel>], iteration_bounds = array<i64: 1>, scalar_prefetch = 0 : i64, scratch_operands = 1 : i64, tpu.core_type = #tpu.core_type<tc>, window_params = [{transform_indices = @transform_0, window_bounds = array<i64: 1, 64, 16>}, {pipeline_mode = #tpu.pipeline_mode<synchronous>, transform_indices = @transform_1, window_bounds = array<i64: 16, 512>}, {pipeline_mode = #tpu.pipeline_mode<synchronous>, transform_indices = @transform_2, window_bounds = array<i64: 128, 512>}, {pipeline_mode = #tpu.pipeline_mode<synchronous>, transform_indices = @transform_3, window_bounds = array<i64: 1, 512>}, {pipeline_mode = #tpu.pipeline_mode<synchronous>, transform_indices = @transform_4, window_bounds = array<i64: 128, 128>}, {pipeline_mode = #tpu.pipeline_mode<synchronous>, transform_indices = @transform_5, window_bounds = array<i64: 1, 128>}, {transform_indices = @transform_6, window_bounds = array<i64: 8, 128>}]} {
    %c0 = arith.constant 0 : index
    %c0_0 = arith.constant 0 : index
    %c0_1 = arith.constant 0 : index
    %0 = vector.load %arg1[%c0, %c0_0, %c0_1] : memref<1x64x16xbf16, #tpu.memory_space<vmem>>, vector<1x64x16xbf16>
    %1 = vector.shape_cast %0 : vector<1x64x16xbf16> to vector<64x16xbf16>
    %c0_2 = arith.constant 0 : index
    %c0_3 = arith.constant 0 : index
    %2 = vector.load %arg2[%c0_2, %c0_3] : memref<16x512xbf16, #tpu.memory_space<vmem>>, vector<16x512xbf16>
    %cst = arith.constant dense<0.000000e+00> : vector<64x512xf32>
    %3 = tpu.matmul %1, %2, %cst {dimension_numbers = #tpu.dot_dimension_numbers<[1], [0], [0], [1], [0, 0, 1, 1], [], []>} : vector<64x16xbf16>, vector<16x512xbf16>, vector<64x512xf32> -> vector<64x512xf32>
    %c0_4 = arith.constant 0 : index
    %c0_5 = arith.constant 0 : index
    %4 = vector.load %arg4[%c0_4, %c0_5] : memref<1x512xf32, #tpu.memory_space<vmem>>, vector<1x512xf32>
    %5 = vector.broadcast %4 : vector<1x512xf32> to vector<64x512xf32>
    %6 = arith.addf %3, %5 : vector<64x512xf32>
    %c0_6 = arith.constant 0 : index
    %c0_7 = arith.constant 0 : index
    %7 = vector.load %arg8[%c0_6, %c0_7] : memref<64x512xf32, #tpu.memory_space<vmem>>, vector<64x512xf32>
    tpu.vector_store %arg8[%c0_6, %c0_7], %6 {strides = array<i32>} : memref<64x512xf32, #tpu.memory_space<vmem>>, vector<64x512xf32>,
    %c0_8 = arith.constant 0 : index
    %c0_9 = arith.constant 0 : index
    %8 = vector.load %arg3[%c0_8, %c0_9] : memref<128x512xbf16, #tpu.memory_space<vmem>>, vector<128x512xbf16>
    %cst_10 = arith.constant 0.000000e+00 : f32
    %9 = vector.broadcast %cst_10 : f32 to vector<8x128xf32>
    %cst_11 = arith.constant 0.000000e+00 : f32
    %10 = vector.broadcast %cst_11 : f32 to vector<8x128xf32>
    %c0_i32 = arith.constant 0 : i32
    %c8_i32 = arith.constant 8 : i32
    %11 = arith.muli %c0_i32, %c8_i32 : i32
    %12 = tpu.assume_multiple %11, 8 : i32
    %13 = arith.index_cast %12 : i32 to index
    %c0_12 = arith.constant 0 : index
    %14 = vector.load %arg8[%13, %c0_12] : memref<64x512xf32, #tpu.memory_space<vmem>>, vector<8x512xf32>
    %15 = arith.truncf %9 : vector<8x128xf32> to vector<8x128xbf16>
    %cst_13 = arith.constant dense<0.000000e+00> : vector<8x512xf32>
    %16 = tpu.matmul %15, %8, %cst_13 {dimension_numbers = #tpu.dot_dimension_numbers<[1], [0], [0], [1], [0, 0, 1, 1], [], []>} : vector<8x128xbf16>, vector<128x512xbf16>, vector<8x512xf32> -> vector<8x512xf32>
    %17 = arith.addf %14, %16 : vector<8x512xf32>
    %18 = vector.extract_strided_slice %17 {offsets = [0, 0], sizes = [8, 128], strides = [1, 1]} : vector<8x512xf32> to vector<8x128xf32>
    %19 = arith.negf %18 : vector<8x128xf32>
    %20 = math.exp %19 : vector<8x128xf32>
    %cst_14 = arith.constant 1.000000e+00 : f32
    %21 = vector.broadcast %cst_14 : f32 to vector<8x128xf32>
    %22 = arith.addf %21, %20 : vector<8x128xf32>
    %23 = arith.divf %21, %22 : vector<8x128xf32>
    %24 = vector.extract_strided_slice %17 {offsets = [0, 128], sizes = [8, 128], strides = [1, 1]} : vector<8x512xf32> to vector<8x128xf32>
    %25 = arith.negf %24 : vector<8x128xf32>
    %26 = math.exp %25 : vector<8x128xf32>
    %cst_15 = arith.constant 1.000000e+00 : f32
    %27 = vector.broadcast %cst_15 : f32 to vector<8x128xf32>
    %28 = arith.addf %27, %26 : vector<8x128xf32>
    %29 = arith.divf %27, %28 : vector<8x128xf32>
    %30 = vector.extract_strided_slice %17 {offsets = [0, 256], sizes = [8, 128], strides = [1, 1]} : vector<8x512xf32> to vector<8x128xf32>
    %31 = math.tanh %30 : vector<8x128xf32>
    %32 = vector.extract_strided_slice %17 {offsets = [0, 384], sizes = [8, 128], strides = [1, 1]} : vector<8x512xf32> to vector<8x128xf32>
    %33 = arith.negf %32 : vector<8x128xf32>
    %34 = math.exp %33 : vector<8x128xf32>
    %cst_16 = arith.constant 1.000000e+00 : f32
    %35 = vector.broadcast %cst_16 : f32 to vector<8x128xf32>
    %36 = arith.addf %35, %34 : vector<8x128xf32>
    %37 = arith.divf %35, %36 : vector<8x128xf32>
    %38 = arith.mulf %29, %10 : vector<8x128xf32>
    %39 = arith.mulf %23, %31 : vector<8x128xf32>
    %40 = arith.addf %38, %39 : vector<8x128xf32>
    %41 = math.tanh %40 : vector<8x128xf32>
    %42 = arith.mulf %37, %41 : vector<8x128xf32>
    %c1_i32 = arith.constant 1 : i32
    %c8_i32_17 = arith.constant 8 : i32
    %43 = arith.muli %c1_i32, %c8_i32_17 : i32
    %44 = tpu.assume_multiple %43, 8 : i32
    %45 = arith.index_cast %44 : i32 to index
    %c0_18 = arith.constant 0 : index
    %46 = vector.load %arg8[%45, %c0_18] : memref<64x512xf32, #tpu.memory_space<vmem>>, vector<8x512xf32>
    %47 = arith.truncf %42 : vector<8x128xf32> to vector<8x128xbf16>
    %cst_19 = arith.constant dense<0.000000e+00> : vector<8x512xf32>
    %48 = tpu.matmul %47, %8, %cst_19 {dimension_numbers = #tpu.dot_dimension_numbers<[1], [0], [0], [1], [0, 0, 1, 1], [], []>} : vector<8x128xbf16>, vector<128x512xbf16>, vector<8x512xf32> -> vector<8x512xf32>
    %49 = arith.addf %46, %48 : vector<8x512xf32>
    %50 = vector.extract_strided_slice %49 {offsets = [0, 0], sizes = [8, 128], strides = [1, 1]} : vector<8x512xf32> to vector<8x128xf32>
    %51 = arith.negf %50 : vector<8x128xf32>
    %52 = math.exp %51 : vector<8x128xf32>
    %cst_20 = arith.constant 1.000000e+00 : f32
    %53 = vector.broadcast %cst_20 : f32 to vector<8x128xf32>
    %54 = arith.addf %53, %52 : vector<8x128xf32>
    %55 = arith.divf %53, %54 : vector<8x128xf32>
    %56 = vector.extract_strided_slice %49 {offsets = [0, 128], sizes = [8, 128], strides = [1, 1]} : vector<8x512xf32> to vector<8x128xf32>
    %57 = arith.negf %56 : vector<8x128xf32>
    %58 = math.exp %57 : vector<8x128xf32>
    %cst_21 = arith.constant 1.000000e+00 : f32
    %59 = vector.broadcast %cst_21 : f32 to vector<8x128xf32>
    %60 = arith.addf %59, %58 : vector<8x128xf32>
    %61 = arith.divf %59, %60 : vector<8x128xf32>
    %62 = vector.extract_strided_slice %49 {offsets = [0, 256], sizes = [8, 128], strides = [1, 1]} : vector<8x512xf32> to vector<8x128xf32>
    %63 = math.tanh %62 : vector<8x128xf32>
    %64 = vector.extract_strided_slice %49 {offsets = [0, 384], sizes = [8, 128], strides = [1, 1]} : vector<8x512xf32> to vector<8x128xf32>
    %65 = arith.negf %64 : vector<8x128xf32>
    %66 = math.exp %65 : vector<8x128xf32>
    %cst_22 = arith.constant 1.000000e+00 : f32
    %67 = vector.broadcast %cst_22 : f32 to vector<8x128xf32>
    %68 = arith.addf %67, %66 : vector<8x128xf32>
    %69 = arith.divf %67, %68 : vector<8x128xf32>
    %70 = arith.mulf %61, %40 : vector<8x128xf32>
    %71 = arith.mulf %55, %63 : vector<8x128xf32>
    %72 = arith.addf %70, %71 : vector<8x128xf32>
    %73 = math.tanh %72 : vector<8x128xf32>
    %74 = arith.mulf %69, %73 : vector<8x128xf32>
    %c2_i32 = arith.constant 2 : i32
    %c8_i32_23 = arith.constant 8 : i32
    %75 = arith.muli %c2_i32, %c8_i32_23 : i32
    %76 = tpu.assume_multiple %75, 8 : i32
    %77 = arith.index_cast %76 : i32 to index
    %c0_24 = arith.constant 0 : index
    %78 = vector.load %arg8[%77, %c0_24] : memref<64x512xf32, #tpu.memory_space<vmem>>, vector<8x512xf32>
    %79 = arith.truncf %74 : vector<8x128xf32> to vector<8x128xbf16>
    %cst_25 = arith.constant dense<0.000000e+00> : vector<8x512xf32>
    %80 = tpu.matmul %79, %8, %cst_25 {dimension_numbers = #tpu.dot_dimension_numbers<[1], [0], [0], [1], [0, 0, 1, 1], [], []>} : vector<8x128xbf16>, vector<128x512xbf16>, vector<8x512xf32> -> vector<8x512xf32>
    %81 = arith.addf %78, %80 : vector<8x512xf32>
    %82 = vector.extract_strided_slice %81 {offsets = [0, 0], sizes = [8, 128], strides = [1, 1]} : vector<8x512xf32> to vector<8x128xf32>
    %83 = arith.negf %82 : vector<8x128xf32>
    %84 = math.exp %83 : vector<8x128xf32>
    %cst_26 = arith.constant 1.000000e+00 : f32
    %85 = vector.broadcast %cst_26 : f32 to vector<8x128xf32>
    %86 = arith.addf %85, %84 : vector<8x128xf32>
    %87 = arith.divf %85, %86 : vector<8x128xf32>
    %88 = vector.extract_strided_slice %81 {offsets = [0, 128], sizes = [8, 128], strides = [1, 1]} : vector<8x512xf32> to vector<8x128xf32>
    %89 = arith.negf %88 : vector<8x128xf32>
    %90 = math.exp %89 : vector<8x128xf32>
    %cst_27 = arith.constant 1.000000e+00 : f32
    %91 = vector.broadcast %cst_27 : f32 to vector<8x128xf32>
    %92 = arith.addf %91, %90 : vector<8x128xf32>
    %93 = arith.divf %91, %92 : vector<8x128xf32>
    %94 = vector.extract_strided_slice %81 {offsets = [0, 256], sizes = [8, 128], strides = [1, 1]} : vector<8x512xf32> to vector<8x128xf32>
    %95 = math.tanh %94 : vector<8x128xf32>
    %96 = vector.extract_strided_slice %81 {offsets = [0, 384], sizes = [8, 128], strides = [1, 1]} : vector<8x512xf32> to vector<8x128xf32>
    %97 = arith.negf %96 : vector<8x128xf32>
    %98 = math.exp %97 : vector<8x128xf32>
    %cst_28 = arith.constant 1.000000e+00 : f32
    %99 = vector.broadcast %cst_28 : f32 to vector<8x128xf32>
    %100 = arith.addf %99, %98 : vector<8x128xf32>
    %101 = arith.divf %99, %100 : vector<8x128xf32>
    %102 = arith.mulf %93, %72 : vector<8x128xf32>
    %103 = arith.mulf %87, %95 : vector<8x128xf32>
    %104 = arith.addf %102, %103 : vector<8x128xf32>
    %105 = math.tanh %104 : vector<8x128xf32>
    %106 = arith.mulf %101, %105 : vector<8x128xf32>
    %c3_i32 = arith.constant 3 : i32
    %c8_i32_29 = arith.constant 8 : i32
    %107 = arith.muli %c3_i32, %c8_i32_29 : i32
    %108 = tpu.assume_multiple %107, 8 : i32
    %109 = arith.index_cast %108 : i32 to index
    %c0_30 = arith.constant 0 : index
    %110 = vector.load %arg8[%109, %c0_30] : memref<64x512xf32, #tpu.memory_space<vmem>>, vector<8x512xf32>
    %111 = arith.truncf %106 : vector<8x128xf32> to vector<8x128xbf16>
    %cst_31 = arith.constant dense<0.000000e+00> : vector<8x512xf32>
    %112 = tpu.matmul %111, %8, %cst_31 {dimension_numbers = #tpu.dot_dimension_numbers<[1], [0], [0], [1], [0, 0, 1, 1], [], []>} : vector<8x128xbf16>, vector<128x512xbf16>, vector<8x512xf32> -> vector<8x512xf32>
    %113 = arith.addf %110, %112 : vector<8x512xf32>
    %114 = vector.extract_strided_slice %113 {offsets = [0, 0], sizes = [8, 128], strides = [1, 1]} : vector<8x512xf32> to vector<8x128xf32>
    %115 = arith.negf %114 : vector<8x128xf32>
    %116 = math.exp %115 : vector<8x128xf32>
    %cst_32 = arith.constant 1.000000e+00 : f32
    %117 = vector.broadcast %cst_32 : f32 to vector<8x128xf32>
    %118 = arith.addf %117, %116 : vector<8x128xf32>
    %119 = arith.divf %117, %118 : vector<8x128xf32>
    %120 = vector.extract_strided_slice %113 {offsets = [0, 128], sizes = [8, 128], strides = [1, 1]} : vector<8x512xf32> to vector<8x128xf32>
    %121 = arith.negf %120 : vector<8x128xf32>
    %122 = math.exp %121 : vector<8x128xf32>
    %cst_33 = arith.constant 1.000000e+00 : f32
    %123 = vector.broadcast %cst_33 : f32 to vector<8x128xf32>
    %124 = arith.addf %123, %122 : vector<8x128xf32>
    %125 = arith.divf %123, %124 : vector<8x128xf32>
    %126 = vector.extract_strided_slice %113 {offsets = [0, 256], sizes = [8, 128], strides = [1, 1]} : vector<8x512xf32> to vector<8x128xf32>
    %127 = math.tanh %126 : vector<8x128xf32>
    %128 = vector.extract_strided_slice %113 {offsets = [0, 384], sizes = [8, 128], strides = [1, 1]} : vector<8x512xf32> to vector<8x128xf32>
    %129 = arith.negf %128 : vector<8x128xf32>
    %130 = math.exp %129 : vector<8x128xf32>
    %cst_34 = arith.constant 1.000000e+00 : f32
    %131 = vector.broadcast %cst_34 : f32 to vector<8x128xf32>
    %132 = arith.addf %131, %130 : vector<8x128xf32>
    %133 = arith.divf %131, %132 : vector<8x128xf32>
    %134 = arith.mulf %125, %104 : vector<8x128xf32>
    %135 = arith.mulf %119, %127 : vector<8x128xf32>
    %136 = arith.addf %134, %135 : vector<8x128xf32>
    %137 = math.tanh %136 : vector<8x128xf32>
    %138 = arith.mulf %133, %137 : vector<8x128xf32>
    %c4_i32 = arith.constant 4 : i32
    %c8_i32_35 = arith.constant 8 : i32
    %139 = arith.muli %c4_i32, %c8_i32_35 : i32
    %140 = tpu.assume_multiple %139, 8 : i32
    %141 = arith.index_cast %140 : i32 to index
    %c0_36 = arith.constant 0 : index
    %142 = vector.load %arg8[%141, %c0_36] : memref<64x512xf32, #tpu.memory_space<vmem>>, vector<8x512xf32>
    %143 = arith.truncf %138 : vector<8x128xf32> to vector<8x128xbf16>
    %cst_37 = arith.constant dense<0.000000e+00> : vector<8x512xf32>
    %144 = tpu.matmul %143, %8, %cst_37 {dimension_numbers = #tpu.dot_dimension_numbers<[1], [0], [0], [1], [0, 0, 1, 1], [], []>} : vector<8x128xbf16>, vector<128x512xbf16>, vector<8x512xf32> -> vector<8x512xf32>
    %145 = arith.addf %142, %144 : vector<8x512xf32>
    %146 = vector.extract_strided_slice %145 {offsets = [0, 0], sizes = [8, 128], strides = [1, 1]} : vector<8x512xf32> to vector<8x128xf32>
    %147 = arith.negf %146 : vector<8x128xf32>
    %148 = math.exp %147 : vector<8x128xf32>
    %cst_38 = arith.constant 1.000000e+00 : f32
    %149 = vector.broadcast %cst_38 : f32 to vector<8x128xf32>
    %150 = arith.addf %149, %148 : vector<8x128xf32>
    %151 = arith.divf %149, %150 : vector<8x128xf32>
    %152 = vector.extract_strided_slice %145 {offsets = [0, 128], sizes = [8, 128], strides = [1, 1]} : vector<8x512xf32> to vector<8x128xf32>
    %153 = arith.negf %152 : vector<8x128xf32>
    %154 = math.exp %153 : vector<8x128xf32>
    %cst_39 = arith.constant 1.000000e+00 : f32
    %155 = vector.broadcast %cst_39 : f32 to vector<8x128xf32>
    %156 = arith.addf %155, %154 : vector<8x128xf32>
    %157 = arith.divf %155, %156 : vector<8x128xf32>
    %158 = vector.extract_strided_slice %145 {offsets = [0, 256], sizes = [8, 128], strides = [1, 1]} : vector<8x512xf32> to vector<8x128xf32>
    %159 = math.tanh %158 : vector<8x128xf32>
    %160 = vector.extract_strided_slice %145 {offsets = [0, 384], sizes = [8, 128], strides = [1, 1]} : vector<8x512xf32> to vector<8x128xf32>
    %161 = arith.negf %160 : vector<8x128xf32>
    %162 = math.exp %161 : vector<8x128xf32>
    %cst_40 = arith.constant 1.000000e+00 : f32
    %163 = vector.broadcast %cst_40 : f32 to vector<8x128xf32>
    %164 = arith.addf %163, %162 : vector<8x128xf32>
    %165 = arith.divf %163, %164 : vector<8x128xf32>
    %166 = arith.mulf %157, %136 : vector<8x128xf32>
    %167 = arith.mulf %151, %159 : vector<8x128xf32>
    %168 = arith.addf %166, %167 : vector<8x128xf32>
    %169 = math.tanh %168 : vector<8x128xf32>
    %170 = arith.mulf %165, %169 : vector<8x128xf32>
    %c5_i32 = arith.constant 5 : i32
    %c8_i32_41 = arith.constant 8 : i32
    %171 = arith.muli %c5_i32, %c8_i32_41 : i32
    %172 = tpu.assume_multiple %171, 8 : i32
    %173 = arith.index_cast %172 : i32 to index
    %c0_42 = arith.constant 0 : index
    %174 = vector.load %arg8[%173, %c0_42] : memref<64x512xf32, #tpu.memory_space<vmem>>, vector<8x512xf32>
    %175 = arith.truncf %170 : vector<8x128xf32> to vector<8x128xbf16>
    %cst_43 = arith.constant dense<0.000000e+00> : vector<8x512xf32>
    %176 = tpu.matmul %175, %8, %cst_43 {dimension_numbers = #tpu.dot_dimension_numbers<[1], [0], [0], [1], [0, 0, 1, 1], [], []>} : vector<8x128xbf16>, vector<128x512xbf16>, vector<8x512xf32> -> vector<8x512xf32>
    %177 = arith.addf %174, %176 : vector<8x512xf32>
    %178 = vector.extract_strided_slice %177 {offsets = [0, 0], sizes = [8, 128], strides = [1, 1]} : vector<8x512xf32> to vector<8x128xf32>
    %179 = arith.negf %178 : vector<8x128xf32>
    %180 = math.exp %179 : vector<8x128xf32>
    %cst_44 = arith.constant 1.000000e+00 : f32
    %181 = vector.broadcast %cst_44 : f32 to vector<8x128xf32>
    %182 = arith.addf %181, %180 : vector<8x128xf32>
    %183 = arith.divf %181, %182 : vector<8x128xf32>
    %184 = vector.extract_strided_slice %177 {offsets = [0, 128], sizes = [8, 128], strides = [1, 1]} : vector<8x512xf32> to vector<8x128xf32>
    %185 = arith.negf %184 : vector<8x128xf32>
    %186 = math.exp %185 : vector<8x128xf32>
    %cst_45 = arith.constant 1.000000e+00 : f32
    %187 = vector.broadcast %cst_45 : f32 to vector<8x128xf32>
    %188 = arith.addf %187, %186 : vector<8x128xf32>
    %189 = arith.divf %187, %188 : vector<8x128xf32>
    %190 = vector.extract_strided_slice %177 {offsets = [0, 256], sizes = [8, 128], strides = [1, 1]} : vector<8x512xf32> to vector<8x128xf32>
    %191 = math.tanh %190 : vector<8x128xf32>
    %192 = vector.extract_strided_slice %177 {offsets = [0, 384], sizes = [8, 128], strides = [1, 1]} : vector<8x512xf32> to vector<8x128xf32>
    %193 = arith.negf %192 : vector<8x128xf32>
    %194 = math.exp %193 : vector<8x128xf32>
    %cst_46 = arith.constant 1.000000e+00 : f32
    %195 = vector.broadcast %cst_46 : f32 to vector<8x128xf32>
    %196 = arith.addf %195, %194 : vector<8x128xf32>
    %197 = arith.divf %195, %196 : vector<8x128xf32>
    %198 = arith.mulf %189, %168 : vector<8x128xf32>
    %199 = arith.mulf %183, %191 : vector<8x128xf32>
    %200 = arith.addf %198, %199 : vector<8x128xf32>
    %201 = math.tanh %200 : vector<8x128xf32>
    %202 = arith.mulf %197, %201 : vector<8x128xf32>
    %c6_i32 = arith.constant 6 : i32
    %c8_i32_47 = arith.constant 8 : i32
    %203 = arith.muli %c6_i32, %c8_i32_47 : i32
    %204 = tpu.assume_multiple %203, 8 : i32
    %205 = arith.index_cast %204 : i32 to index
    %c0_48 = arith.constant 0 : index
    %206 = vector.load %arg8[%205, %c0_48] : memref<64x512xf32, #tpu.memory_space<vmem>>, vector<8x512xf32>
    %207 = arith.truncf %202 : vector<8x128xf32> to vector<8x128xbf16>
    %cst_49 = arith.constant dense<0.000000e+00> : vector<8x512xf32>
    %208 = tpu.matmul %207, %8, %cst_49 {dimension_numbers = #tpu.dot_dimension_numbers<[1], [0], [0], [1], [0, 0, 1, 1], [], []>} : vector<8x128xbf16>, vector<128x512xbf16>, vector<8x512xf32> -> vector<8x512xf32>
    %209 = arith.addf %206, %208 : vector<8x512xf32>
    %210 = vector.extract_strided_slice %209 {offsets = [0, 0], sizes = [8, 128], strides = [1, 1]} : vector<8x512xf32> to vector<8x128xf32>
    %211 = arith.negf %210 : vector<8x128xf32>
    %212 = math.exp %211 : vector<8x128xf32>
    %cst_50 = arith.constant 1.000000e+00 : f32
    %213 = vector.broadcast %cst_50 : f32 to vector<8x128xf32>
    %214 = arith.addf %213, %212 : vector<8x128xf32>
    %215 = arith.divf %213, %214 : vector<8x128xf32>
    %216 = vector.extract_strided_slice %209 {offsets = [0, 128], sizes = [8, 128], strides = [1, 1]} : vector<8x512xf32> to vector<8x128xf32>
    %217 = arith.negf %216 : vector<8x128xf32>
    %218 = math.exp %217 : vector<8x128xf32>
    %cst_51 = arith.constant 1.000000e+00 : f32
    %219 = vector.broadcast %cst_51 : f32 to vector<8x128xf32>
    %220 = arith.addf %219, %218 : vector<8x128xf32>
    %221 = arith.divf %219, %220 : vector<8x128xf32>
    %222 = vector.extract_strided_slice %209 {offsets = [0, 256], sizes = [8, 128], strides = [1, 1]} : vector<8x512xf32> to vector<8x128xf32>
    %223 = math.tanh %222 : vector<8x128xf32>
    %224 = vector.extract_strided_slice %209 {offsets = [0, 384], sizes = [8, 128], strides = [1, 1]} : vector<8x512xf32> to vector<8x128xf32>
    %225 = arith.negf %224 : vector<8x128xf32>
    %226 = math.exp %225 : vector<8x128xf32>
    %cst_52 = arith.constant 1.000000e+00 : f32
    %227 = vector.broadcast %cst_52 : f32 to vector<8x128xf32>
    %228 = arith.addf %227, %226 : vector<8x128xf32>
    %229 = arith.divf %227, %228 : vector<8x128xf32>
    %230 = arith.mulf %221, %200 : vector<8x128xf32>
    %231 = arith.mulf %215, %223 : vector<8x128xf32>
    %232 = arith.addf %230, %231 : vector<8x128xf32>
    %233 = math.tanh %232 : vector<8x128xf32>
    %234 = arith.mulf %229, %233 : vector<8x128xf32>
    %c7_i32 = arith.constant 7 : i32
    %c8_i32_53 = arith.constant 8 : i32
    %235 = arith.muli %c7_i32, %c8_i32_53 : i32
    %236 = tpu.assume_multiple %235, 8 : i32
    %237 = arith.index_cast %236 : i32 to index
    %c0_54 = arith.constant 0 : index
    %238 = vector.load %arg8[%237, %c0_54] : memref<64x512xf32, #tpu.memory_space<vmem>>, vector<8x512xf32>
    %239 = arith.truncf %234 : vector<8x128xf32> to vector<8x128xbf16>
    %cst_55 = arith.constant dense<0.000000e+00> : vector<8x512xf32>
    %240 = tpu.matmul %239, %8, %cst_55 {dimension_numbers = #tpu.dot_dimension_numbers<[1], [0], [0], [1], [0, 0, 1, 1], [], []>} : vector<8x128xbf16>, vector<128x512xbf16>, vector<8x512xf32> -> vector<8x512xf32>
    %241 = arith.addf %238, %240 : vector<8x512xf32>
    %242 = vector.extract_strided_slice %241 {offsets = [0, 0], sizes = [8, 128], strides = [1, 1]} : vector<8x512xf32> to vector<8x128xf32>
    %243 = arith.negf %242 : vector<8x128xf32>
    %244 = math.exp %243 : vector<8x128xf32>
    %cst_56 = arith.constant 1.000000e+00 : f32
    %245 = vector.broadcast %cst_56 : f32 to vector<8x128xf32>
    %246 = arith.addf %245, %244 : vector<8x128xf32>
    %247 = arith.divf %245, %246 : vector<8x128xf32>
    %248 = vector.extract_strided_slice %241 {offsets = [0, 128], sizes = [8, 128], strides = [1, 1]} : vector<8x512xf32> to vector<8x128xf32>
    %249 = arith.negf %248 : vector<8x128xf32>
    %250 = math.exp %249 : vector<8x128xf32>
    %cst_57 = arith.constant 1.000000e+00 : f32
    %251 = vector.broadcast %cst_57 : f32 to vector<8x128xf32>
    %252 = arith.addf %251, %250 : vector<8x128xf32>
    %253 = arith.divf %251, %252 : vector<8x128xf32>
    %254 = vector.extract_strided_slice %241 {offsets = [0, 256], sizes = [8, 128], strides = [1, 1]} : vector<8x512xf32> to vector<8x128xf32>
    %255 = math.tanh %254 : vector<8x128xf32>
    %256 = vector.extract_strided_slice %241 {offsets = [0, 384], sizes = [8, 128], strides = [1, 1]} : vector<8x512xf32> to vector<8x128xf32>
    %257 = arith.negf %256 : vector<8x128xf32>
    %258 = math.exp %257 : vector<8x128xf32>
    %cst_58 = arith.constant 1.000000e+00 : f32
    %259 = vector.broadcast %cst_58 : f32 to vector<8x128xf32>
    %260 = arith.addf %259, %258 : vector<8x128xf32>
    %261 = arith.divf %259, %260 : vector<8x128xf32>
    %262 = arith.mulf %253, %232 : vector<8x128xf32>
    %263 = arith.mulf %247, %255 : vector<8x128xf32>
    %264 = arith.addf %262, %263 : vector<8x128xf32>
    %265 = math.tanh %264 : vector<8x128xf32>
    %266 = arith.mulf %261, %265 : vector<8x128xf32>
    %c8_i32_59 = arith.constant 8 : i32
    %267 = arith.truncf %266 : vector<8x128xf32> to vector<8x128xbf16>
    %c0_60 = arith.constant 0 : index
    %c0_61 = arith.constant 0 : index
    %268 = vector.load %arg5[%c0_60, %c0_61] : memref<128x128xbf16, #tpu.memory_space<vmem>>, vector<128x128xbf16>
    %cst_62 = arith.constant dense<0.000000e+00> : vector<8x128xf32>
    %269 = tpu.matmul %267, %268, %cst_62 {dimension_numbers = #tpu.dot_dimension_numbers<[1], [0], [0], [1], [0, 0, 1, 1], [], []>} : vector<8x128xbf16>, vector<128x128xbf16>, vector<8x128xf32> -> vector<8x128xf32>
    %c0_63 = arith.constant 0 : index
    %c0_64 = arith.constant 0 : index
    %270 = vector.load %arg6[%c0_63, %c0_64] : memref<1x128xf32, #tpu.memory_space<vmem>>, vector<1x128xf32>
    %271 = vector.broadcast %270 : vector<1x128xf32> to vector<8x128xf32>
    %272 = arith.addf %269, %271 : vector<8x128xf32>
    %c0_65 = arith.constant 0 : index
    %c0_66 = arith.constant 0 : index
    %273 = vector.load %arg7[%c0_65, %c0_66] : memref<8x128xf32, #tpu.memory_space<vmem>>, vector<8x128xf32>
    tpu.vector_store %arg7[%c0_65, %c0_66], %272 {strides = array<i32>} : memref<8x128xf32, #tpu.memory_space<vmem>>, vector<8x128xf32>,
    return
  }
  func.func @transform_0(%arg0: i32) -> (i32, i32, i32) {
    %c0_i32 = arith.constant 0 : i32
    %c0_i32_0 = arith.constant 0 : i32
    %c0_i32_1 = arith.constant 0 : i32
    return %arg0, %c0_i32, %c0_i32_0 : i32, i32, i32
  }
  func.func @transform_1(%arg0: i32) -> (i32, i32) {
    %c0_i32 = arith.constant 0 : i32
    %c0_i32_0 = arith.constant 0 : i32
    %c0_i32_1 = arith.constant 0 : i32
    return %c0_i32, %c0_i32_0 : i32, i32
  }
  func.func @transform_2(%arg0: i32) -> (i32, i32) {
    %c0_i32 = arith.constant 0 : i32
    %c0_i32_0 = arith.constant 0 : i32
    %c0_i32_1 = arith.constant 0 : i32
    return %c0_i32, %c0_i32_0 : i32, i32
  }
  func.func @transform_3(%arg0: i32) -> (i32, i32) {
    %c0_i32 = arith.constant 0 : i32
    %c0_i32_0 = arith.constant 0 : i32
    %c0_i32_1 = arith.constant 0 : i32
    return %c0_i32, %c0_i32_0 : i32, i32
  }
  func.func @transform_4(%arg0: i32) -> (i32, i32) {
    %c0_i32 = arith.constant 0 : i32
    %c0_i32_0 = arith.constant 0 : i32
    %c0_i32_1 = arith.constant 0 : i32
    return %c0_i32, %c0_i32_0 : i32, i32
  }
  func.func @transform_5(%arg0: i32) -> (i32, i32) {
    %c0_i32 = arith.constant 0 : i32
    %c0_i32_0 = arith.constant 0 : i32
    %c0_i32_1 = arith.constant 0 : i32
    return %c0_i32, %c0_i32_0 : i32, i32
  }
  func.func @transform_6(%arg0: i32) -> (i32, i32) {
    %c0_i32 = arith.constant 0 : i32
    %c0_i32_0 = arith.constant 0 : i32
    return %arg0, %c0_i32 : i32, i32
  }
}

</mosaic_0001>

<bundles_post_ra>
// kernel: tpu_custom_call.1
= control target key start
LH: loop header
LB: loop body
LE: loop exit
PB: predicated region body
PF: predicated region fallthrough
CT: control target
= control target key end

     0   :  { %11 = vsyncpa [#allocation4], 0  ;;  %s2700_s0 = inlined_call_operand.vmem [shape: bf16[1,64,16], index: 0, kind: input, shape index: {}]   ;;  %s2701_s1 = inlined_call_operand.vmem [shape: bf16[16,512], index: 1, kind: input, shape index: {}]   ;;  %s2702_s2 = inlined_call_operand.hbm [shape: bf16[128,512], index: 2, kind: input, shape index: {}]   ;;  %s2703_s3 = inlined_call_operand.vmem [shape: f32[1,512], index: 3, kind: input, shape index: {}]   ;;  %s2704_s4 = inlined_call_operand.hbm [shape: bf16[128,128], index: 4, kind: input, shape index: {}]   ;;  %s2705_s5 = inlined_call_operand.vmem [shape: f32[1,128], index: 5, kind: input, shape index: {}]   ;;  %s2706_s6 = inlined_call_operand.hbm [shape: f32[8,128], index: 6, kind: output, shape index: {}]  }
   0x1   :  { %12 = vsyncpa [#allocation7], 0 }
   0x2   :  { %13 = vsyncpa [#allocation5], 0  ;;  %s22_s23 = sshll.u32 %s2702_s2, 4  ;;  %s2091_s24 = smov [#allocation3]   ;;  %s23_s23 = int_to_ptr.hbm [resolvable:$true] %s22_s23 }
   0x3   :  { %s24_s25 = sshll.u32 %s2091_s24, 4  ;;  %s37_s28 = sshll.u32 %s2704_s4, 4  ;;  %s25_s25 = int_to_ptr.vmem [resolvable:$true] %s24_s25  ;;  %s38_s28 = int_to_ptr.hbm [resolvable:$true] %s37_s28 }
   0x4   :  { %s2092_s29 = smov 256   ;;  %s2093_s30 = smov 16  }
   0x5   :  { %30 = dma.hbm_to_vmem [thread:$0]  %s23_s23, 4096, %s25_s25, [#allocation4], %s2092_s29, %s2092_s29, %s2093_s30  }
   0x6   :  { %s2094_s7 = smov [#allocation6]   ;;  %s2095_s9 = smov 64  }
   0x7   :  { %s39_s8 = sshll.u32 %s2094_s7, 4  ;;  %s2096_s10 = smov 4   ;;  %s40_s8 = int_to_ptr.vmem [resolvable:$true] %s39_s8 }
   0x8   :  { %45 = dma.hbm_to_vmem [thread:$0]  %s38_s28, 1024, %s40_s8, [#allocation7], %s2095_s9, %s2095_s9, %s2096_s10  }
   0x9   :  { %2085 = dma.done.wait [#allocation4], 4096  }
   0xa   :  { %2086 = vsyncadd [#allocation4], 4294963200 }
   0xb   :  { %2087 = dma.done.wait [#allocation7], 1024  }
   0xc   :  { %2088 = vsyncadd [#allocation7], 4294966272  ;;  %v1613_v0 = vld [vmem:[%s2701_s1] sm:$0xf]  ;;  %v1833_v1 = vld [vmem:[%s2701_s1 + $0xc] sm:$0xf0] }
   0xd   :  { %v1621_v2 = vld [vmem:[%s2701_s1 + $0x8] sm:$0xf]  ;;  %v1614_v3 = vor.u32 %v1833_v1, %v1613_v0  ;;  %v1834_v4 = vld [vmem:[%s2701_s1 + $0x14] sm:$0xf0]  ;;  %v1832_v5 = vld [vmem:[%s2701_s1 + $0xc] sm:$0xf] }
   0xe   :  { %v1623_v6 = vld [vmem:[%s2701_s1 + $0x18] sm:$0xf0]  ;;  %v1622_v7 = vor.u32 %v1834_v4, %v1621_v2  ;;  %v2161_v9 = vld [vmem:[%s2700_s0] sm:$0xff]  ;;  %vm119_vm0 = vcmask 130048   ;;  %v1615_v12 = vld [vmem:[%s2701_s1 + $0x10] sm:$0xf0] }
   0xf   :  { %v1626_v8 = vor.u32 %v1832_v5, %v1623_v6  ;;  %v2166_v10 = vld [vmem:[%s2700_s0 + $0x18] sm:$0xff]  ;;  %v1831_v11 = vld [vmem:[%s2701_s1 + $0x4] sm:$0xf]  ;;  %139 = vmatpush.bf16.msra.mxu0 %v1614_v3  ;;  %1875 = vmatpush.bf16.msra.mxu1 %v1614_v3  ;;  %v1759_v15 = vld [vmem:[#allocation3 + $0xf0] sm:$0xf0]  ;;  %s2098_s10 = smov [#allocation8]  }
  0x10   :  { %v1863_v13 = vld [vmem:[#allocation3 + $0xe4] sm:$0xf]  ;;  %197 = vmatpush.bf16.msra.mxu2 %v1622_v7  ;;  %v1618_v14 = vor.u32 %v1831_v11, %v1615_v12  ;;  %v1757_v16 = vld [vmem:[#allocation3 + $0xe0] sm:$0xf]  ;;  %v1865_v17 = vld [vmem:[#allocation3 + $0xec] sm:$0xf0] }
  0x11   :  { %226 = vmatpush.bf16.msra.mxu3 %v1626_v8  ;;  %v2174_v18 = vor.u32 %v1863_v13, %v1759_v15  ;;  %v2176_v19 = vor.u32 %v1865_v17, %v1757_v16  ;;  %v1741_v20 = vld [vmem:[#allocation3 + $0xc0] sm:$0xf]  ;;  %v1861_v21 = vld [vmem:[#allocation3 + $0xcc] sm:$0xf0]  ;;  %v1864_v22 = vld [vmem:[#allocation3 + $0xec] sm:$0xf] }
  0x12   :  { %1627 = vmatmul.msk.bf16.vlgmr.msra.gmra.mxu0 %vm119_vm0, %v2161_v9  ;;  %1630 = vmatmul.msk.bf16.vlgmr.msra.gmra.mxu1 %vm119_vm0, %v2166_v10  ;;  %v1767_v23 = vld [vmem:[#allocation3 + $0xf8] sm:$0xf0]  ;;  %v1859_v24 = vld [vmem:[#allocation3 + $0xc4] sm:$0xf]  ;;  %v1743_v25 = vld [vmem:[#allocation3 + $0xd0] sm:$0xf0]  ;;  %v2192_v30 = vor.u32 %v1861_v21, %v1741_v20 }
  0x13   :  { %168 = vmatpush.bf16.msrb.mxu1 %v1618_v14  ;;  %1635 = vmatmul.msk.bf16.vlgmr.msra.gmra.mxu2 %vm119_vm0, %v2161_v9  ;;  %v2184_v26 = vor.u32 %v1864_v22, %v1767_v23  ;;  %v2189_v27 = vor.u32 %v1859_v24, %v1743_v25  ;;  %v1860_v28 = vld [vmem:[#allocation3 + $0xcc] sm:$0xf]  ;;  %v1751_v29 = vld [vmem:[#allocation3 + $0xd8] sm:$0xf0]  ;;  %v1725_v31 = vld [vmem:[#allocation3 + $0xa0] sm:$0xf] }
  0x14   :  { %1639 = vmatmul.msk.bf16.vlgmr.msra.gmra.mxu3 %vm119_vm0, %v2161_v9  ;;  %479 = vmatpush.bf16.msrb.mxu0 %v2176_v19  ;;  %v2195_v32 = vor.u32 %v1860_v28, %v1751_v29  ;;  %v1765_v33 = vld [vmem:[#allocation3 + $0xe8] sm:$0xf]  ;;  %v1866_v34 = vld [vmem:[#allocation3 + $0xf4] sm:$0xf0]  ;;  %v1857_v35 = vld [vmem:[#allocation3 + $0xac] sm:$0xf0] }
  0x15   :  { %518 = vmatpush.bf16.msrb.mxu3 %v2184_v26  ;;  %v2197_v36 = vor.u32 %v1866_v34, %v1765_v33  ;;  %v1855_v37 = vld [vmem:[#allocation3 + $0xa4] sm:$0xf]  ;;  %v1727_v38 = vld [vmem:[#allocation3 + $0xb0] sm:$0xf0]  ;;  %v1749_v40 = vld [vmem:[#allocation3 + $0xc8] sm:$0xf]  ;;  %v2204_v43 = vor.u32 %v1857_v35, %v1725_v31 }
  0x16   :  { %v2201_v39 = vor.u32 %v1855_v37, %v1727_v38  ;;  %v1862_v41 = vld [vmem:[#allocation3 + $0xd4] sm:$0xf0]  ;;  %v1856_v42 = vld [vmem:[#allocation3 + $0xac] sm:$0xf]  ;;  %v1735_v45 = vld [vmem:[#allocation3 + $0xb8] sm:$0xf0] }
  0x17   :  { %492 = vmatpush.bf16.msra.mxu1 %v2174_v18  ;;  %505 = vmatpush.bf16.msrb.mxu2 %v2197_v36  ;;  %v2207_v44 = vor.u32 %v1862_v41, %v1749_v40  ;;  %v1851_v46 = vld [vmem:[#allocation3 + $0x84] sm:$0xf]  ;;  %v1711_v47 = vld [vmem:[#allocation3 + $0x90] sm:$0xf0]  ;;  %v1709_v48 = vld [vmem:[#allocation3 + $0x80] sm:$0xf]  ;;  %v2209_v50 = vor.u32 %v1856_v42, %v1735_v45 }
  0x18   :  { %480 = vmatpush.bf16.msrb.mxu0 %v2192_v30  ;;  %v1853_v49 = vld [vmem:[#allocation3 + $0x8c] sm:$0xf0]  ;;  %v1733_v51 = vld [vmem:[#allocation3 + $0xa8] sm:$0xf]  ;;  %v1858_v52 = vld [vmem:[#allocation3 + $0xb4] sm:$0xf0]  ;;  %v2213_v53 = vor.u32 %v1851_v46, %v1711_v47 }
  0x19   :  { %519 = vmatpush.bf16.msrb.mxu3 %v2195_v32  ;;  %v2215_v54 = vor.u32 %v1858_v52, %v1733_v51  ;;  %v1717_v55 = vld [vmem:[#allocation3 + $0x88] sm:$0xf]  ;;  %v1852_v56 = vld [vmem:[#allocation3 + $0x8c] sm:$0xf]  ;;  %v2218_v57 = vor.u32 %v1853_v49, %v1709_v48  ;;  %v1854_v58 = vld [vmem:[#allocation3 + $0x94] sm:$0xf0] }
  0x1a   :  { %v1719_v59 = vld [vmem:[#allocation3 + $0x98] sm:$0xf0]  ;;  %v2224_v60 = vld [vmem:[%s2700_s0 + $0x8] sm:$0xff]  ;;  %v1693_v61 = vld [vmem:[#allocation3 + $0x60] sm:$0xf]  ;;  %v2230_v0 = vor.u32 %v1854_v58, %v1717_v55  ;;  %s1575_s2 = sshll.u32 %s2098_s10, 4  ;;  %s1576_s2 = int_to_ptr.vmem [resolvable:$true] %s1575_s2 }
  0x1b   :  { %493 = vmatpush.bf16.msra.mxu1 %v2189_v27  ;;  %506 = vmatpush.bf16.msrb.mxu2 %v2207_v44  ;;  %v1849_v62 = vld [vmem:[#allocation3 + $0x6c] sm:$0xf0]  ;;  %v2226_v63 = vor.u32 %v1852_v56, %v1719_v59  ;;  %v1677_v2 = vld [vmem:[#allocation3 + $0x40] sm:$0xf]  ;;  %v1701_v4 = vld [vmem:[#allocation3 + $0x68] sm:$0xf] }
  0x1c   :  { %481 = vmatpush.bf16.msrb.mxu0 %v2204_v43  ;;  %v2233_v1 = vor.u32 %v1849_v62, %v1693_v61  ;;  %v1845_v3 = vld [vmem:[#allocation3 + $0x4c] sm:$0xf0]  ;;  %v1850_v5 = vld [vmem:[#allocation3 + $0x74] sm:$0xf0]  ;;  %v1848_v6 = vld [vmem:[#allocation3 + $0x6c] sm:$0xf] }
  0x1d   :  { %520 = vmatpush.bf16.msrb.mxu3 %v2209_v50  ;;  %v1703_v7 = vld [vmem:[#allocation3 + $0x78] sm:$0xf0]  ;;  %v1661_v8 = vld [vmem:[#allocation3 + $0x20] sm:$0xf]  ;;  %v1847_v11 = vld [vmem:[#allocation3 + $0x64] sm:$0xf]  ;;  %v2245_v13 = vor.u32 %v1850_v5, %v1701_v4  ;;  %v2250_v15 = vor.u32 %v1845_v3, %v1677_v2 }
  0x1e   :  { %v1695_v12 = vld [vmem:[#allocation3 + $0x70] sm:$0xf0]  ;;  %v2247_v14 = vor.u32 %v1848_v6, %v1703_v7  ;;  %v1846_v17 = vld [vmem:[#allocation3 + $0x54] sm:$0xf0]  ;;  %v1844_v20 = vld [vmem:[#allocation3 + $0x4c] sm:$0xf] }
  0x1f   :  { %494 = vmatpush.bf16.msra.mxu1 %v2201_v39  ;;  %507 = vmatpush.bf16.msrb.mxu2 %v2215_v54  ;;  %v2252_v16 = vor.u32 %v1847_v11, %v1695_v12  ;;  %v1687_v21 = vld [vmem:[#allocation3 + $0x58] sm:$0xf0]  ;;  %v1841_v22 = vld [vmem:[#allocation3 + $0x2c] sm:$0xf0]  ;;  %v1843_v24 = vld [vmem:[#allocation3 + $0x44] sm:$0xf] }
  0x20   :  { %482 = vmatpush.bf16.msrb.mxu0 %v2218_v57  ;;  %v2255_v23 = vor.u32 %v1844_v20, %v1687_v21  ;;  %v1679_v25 = vld [vmem:[#allocation3 + $0x50] sm:$0xf0]  ;;  %v1840_v29 = vld [vmem:[#allocation3 + $0x2c] sm:$0xf]  ;;  %v1671_v31 = vld [vmem:[#allocation3 + $0x38] sm:$0xf0]  ;;  %v2264_v34 = vor.u32 %v1841_v22, %v1661_v8 }
  0x21   :  { %521 = vmatpush.bf16.msrb.mxu3 %v2226_v63  ;;  %v2258_v28 = vor.u32 %v1843_v24, %v1679_v25  ;;  %v1669_v35 = vld [vmem:[#allocation3 + $0x28] sm:$0xf]  ;;  %v1842_v37 = vld [vmem:[#allocation3 + $0x34] sm:$0xf0]  ;;  %v1645_v38 = vld [vmem:[#allocation3] sm:$0xf]  ;;  %v2267_v41 = vor.u32 %v1840_v29, %v1671_v31 }
  0x22   :  { %1628 = vmatmul.msk.bf16.gmra.mxu0 %vm119_vm0, %v2224_v60  ;;  %1631 = vmatmul.msk.bf16.vlgmr.msrb.gmra.mxu1 %vm119_vm0, %v2161_v9  ;;  %v1685_v9 = vld [vmem:[#allocation3 + $0x48] sm:$0xf]  ;;  %v1837_v40 = vld [vmem:[#allocation3 + $0xc] sm:$0xf0]  ;;  %v2271_v42 = vor.u32 %v1842_v37, %v1669_v35  ;;  %v1836_v45 = vld [vmem:[#allocation3 + $0xc] sm:$0xf] }
  0x23   :  { %495 = vmatpush.bf16.msra.mxu1 %v2213_v53  ;;  %1636 = vmatmul.msk.bf16.gmra.mxu2 %vm119_vm0, %v2224_v60  ;;  %v2261_v33 = vor.u32 %v1846_v17, %v1685_v9  ;;  %v1655_v46 = vld [vmem:[#allocation3 + $0x18] sm:$0xf0]  ;;  %v2274_v47 = vor.u32 %v1837_v40, %v1645_v38  ;;  %v1653_v48 = vld [vmem:[#allocation3 + $0x8] sm:$0xf]  ;;  %v1838_v49 = vld [vmem:[#allocation3 + $0x14] sm:$0xf0] }
  0x24   :  { %1640 = vmatmul.msk.bf16.gmra.mxu3 %vm119_vm0, %v2224_v60  ;;  %508 = vmatpush.bf16.msrb.mxu2 %v2230_v0  ;;  %v1829_v51 = vld [vmem:[%s2700_s0 + $0x10] sm:$0xff]  ;;  %v2280_v52 = vor.u32 %v1836_v45, %v1655_v46  ;;  %v2283_v55 = vor.u32 %v1838_v49, %v1653_v48  ;;  %v1839_v56 = vld [vmem:[#allocation3 + $0x24] sm:$0xf]  ;;  %s1577_s4 = sshll.u32 %s2706_s6, 4  ;;  %s1578_s4 = int_to_ptr.hbm [resolvable:$true] %s1577_s4 }
  0x25   :  { %483 = vmatpush.bf16.msrb.mxu0 %v2233_v1  ;;  %522 = vmatpush.bf16.msrb.mxu3 %v2247_v14  ;;  %v1663_v58 = vld [vmem:[#allocation3 + $0x30] sm:$0xf0]  ;;  %v1835_v61 = vld [vmem:[#allocation3 + $0x4] sm:$0xf] }
  0x26   :  { %v2291_v59 = vor.u32 %v1839_v56, %v1663_v58  ;;  %v1647_v62 = vld [vmem:[#allocation3 + $0x10] sm:$0xf0] }
  0x27   :  { %496 = vmatpush.bf16.msra.mxu1 %v2252_v16  ;;  %v2296_v2 = vor.u32 %v1835_v61, %v1647_v62 }
  0x28   :  { %509 = vmatpush.bf16.msrb.mxu2 %v2245_v13 }
  0x29   :  { %484 = vmatpush.bf16.msrb.mxu0 %v2250_v15  ;;  %523 = vmatpush.bf16.msrb.mxu3 %v2255_v23 }
  0x2b   :  { %497 = vmatpush.bf16.msra.mxu1 %v2258_v28 }
  0x2c   :  { %510 = vmatpush.bf16.msrb.mxu2 %v2261_v33 }
  0x2d   :  { %485 = vmatpush.bf16.msrb.mxu0 %v2264_v34  ;;  %524 = vmatpush.bf16.msrb.mxu3 %v2267_v41 }
  0x2f   :  { %498 = vmatpush.bf16.msra.mxu1 %v2291_v59 }
  0x30   :  { %511 = vmatpush.bf16.msrb.mxu2 %v2271_v42 }
  0x31   :  { %486 = vmatpush.bf16.msrb.mxu0 %v2274_v47  ;;  %525 = vmatpush.bf16.msrb.mxu3 %v2280_v52 }
  0x32   :  { %1629 = vmatmul.msk.bf16.gmra.mxu0 %vm119_vm0, %v1829_v51  ;;  %1632 = vmatmul.msk.bf16.gmra.mxu1 %vm119_vm0, %v2224_v60  ;;  %v2097_v60 = vmov 0  }
  0x33   :  { %1637 = vmatmul.msk.bf16.gmra.mxu2 %vm119_vm0, %v1829_v51  ;;  %499 = vmatpush.bf16.msra.mxu1 %v2296_v2 }
  0x34   :  { %1641 = vmatmul.msk.bf16.gmra.mxu3 %vm119_vm0, %v1829_v51  ;;  %512 = vmatpush.bf16.msrb.mxu2 %v2283_v55 }
  0x35   :  { %606 = vmatpush.bf16.msra.mxu0 %v2176_v19  ;;  %645 = vmatpush.bf16.msra.mxu3 %v2184_v26 }
  0x37   :  { %619 = vmatpush.bf16.msrb.mxu1 %v2174_v18 }
  0x38   :  { %632 = vmatpush.bf16.msra.mxu2 %v2197_v36 }
  0x39   :  { %607 = vmatpush.bf16.msra.mxu0 %v2192_v30  ;;  %646 = vmatpush.bf16.msra.mxu3 %v2195_v32 }
  0x3b   :  { %620 = vmatpush.bf16.msrb.mxu1 %v2189_v27 }
  0x3c   :  { %633 = vmatpush.bf16.msra.mxu2 %v2207_v44 }
  0x3d   :  { %608 = vmatpush.bf16.msra.mxu0 %v2204_v43  ;;  %647 = vmatpush.bf16.msra.mxu3 %v2209_v50 }
  0x3f   :  { %621 = vmatpush.bf16.msrb.mxu1 %v2201_v39 }
  0x40   :  { %634 = vmatpush.bf16.msra.mxu2 %v2215_v54 }
  0x41   :  { %609 = vmatpush.bf16.msra.mxu0 %v2218_v57  ;;  %648 = vmatpush.bf16.msra.mxu3 %v2226_v63 }
  0x42   :  { %1633 = vmatmul.msk.bf16.gmra.mxu1 %vm119_vm0, %v1829_v51  ;;  %487 = vmatmul.bf16.vlgmr.msrb.gmra.mxu0 %v2097_v60 }
  0x43   :  { %1638 = vmatmul.msk.bf16.gmra.mxu2 %vm119_vm0, %v2166_v10  ;;  %622 = vmatpush.bf16.msrb.mxu1 %v2213_v53 }
  0x44   :  { %1642 = vmatmul.msk.bf16.gmra.mxu3 %vm119_vm0, %v2166_v10  ;;  %635 = vmatpush.bf16.msra.mxu2 %v2230_v0 }
  0x45   :  { %610 = vmatpush.bf16.msra.mxu0 %v2233_v1  ;;  %649 = vmatpush.bf16.msra.mxu3 %v2247_v14 }
  0x47   :  { %623 = vmatpush.bf16.msrb.mxu1 %v2252_v16 }
  0x48   :  { %636 = vmatpush.bf16.msra.mxu2 %v2245_v13 }
  0x49   :  { %611 = vmatpush.bf16.msra.mxu0 %v2250_v15  ;;  %650 = vmatpush.bf16.msra.mxu3 %v2255_v23 }
  0x4b   :  { %624 = vmatpush.bf16.msrb.mxu1 %v2258_v28 }
  0x4c   :  { %637 = vmatpush.bf16.msra.mxu2 %v2261_v33 }
  0x4d   :  { %612 = vmatpush.bf16.msra.mxu0 %v2264_v34  ;;  %651 = vmatpush.bf16.msra.mxu3 %v2267_v41 }
  0x4f   :  { %625 = vmatpush.bf16.msrb.mxu1 %v2291_v59 }
  0x50   :  { %638 = vmatpush.bf16.msra.mxu2 %v2271_v42 }
  0x51   :  { %613 = vmatpush.bf16.msra.mxu0 %v2274_v47  ;;  %652 = vmatpush.bf16.msra.mxu3 %v2280_v52 }
  0x52   :  { %1634 = vmatmul.msk.bf16.gmra.mxu1 %vm119_vm0, %v2166_v10  ;;  %v69_v10 = vld [vmem:[%s2703_s3] sm:$0xf] }
  0x53   :  { %513 = vmatmul.bf16.vlgmr.msrb.gmra.mxu2 %v2097_v60  ;;  %626 = vmatpush.bf16.msrb.mxu1 %v2296_v2  ;;  %v2373_v3 = vperm.slane %v69_v10, 0  ;;  %v2387_v17 = vperm.slane %v69_v10, 2  ;;  %v2389_v20 = vperm.slane %v69_v10, 3  ;;  %v2402_v38 = vperm.slane %v69_v10, 1 }
  0x54   :  { %526 = vmatmul.bf16.vlgmr.msrb.gmra.mxu3 %v2097_v60  ;;  %639 = vmatpush.bf16.msra.mxu2 %v2283_v55 }
  0x55   :  { %733 = vmatpush.bf16.msrb.mxu0 %v2176_v19  ;;  %772 = vmatpush.bf16.msrb.mxu3 %v2184_v26  ;;  %2708 = vst [vmem:[#allocation12_spill] sm:$0xff] %v2373_v3 }
  0x58   :  { %759 = vmatpush.bf16.msrb.mxu2 %v2197_v36 }
  0x59   :  { %734 = vmatpush.bf16.msrb.mxu0 %v2192_v30  ;;  %773 = vmatpush.bf16.msrb.mxu3 %v2195_v32 }
  0x5c   :  { %760 = vmatpush.bf16.msrb.mxu2 %v2207_v44 }
  0x5d   :  { %735 = vmatpush.bf16.msrb.mxu0 %v2204_v43  ;;  %774 = vmatpush.bf16.msrb.mxu3 %v2209_v50 }
  0x60   :  { %761 = vmatpush.bf16.msrb.mxu2 %v2215_v54 }
  0x61   :  { %736 = vmatpush.bf16.msrb.mxu0 %v2218_v57  ;;  %775 = vmatpush.bf16.msrb.mxu3 %v2226_v63 }
  0x62   :  { %500 = vmatmul.bf16.vlgmr.msra.gmra.mxu1 %v2097_v60 }
  0x63   :  { %746 = vmatpush.bf16.msra.mxu1 %v2174_v18 }
  0x64   :  { %762 = vmatpush.bf16.msrb.mxu2 %v2230_v0 }
  0x65   :  { %737 = vmatpush.bf16.msrb.mxu0 %v2233_v1  ;;  %776 = vmatpush.bf16.msrb.mxu3 %v2247_v14 }
  0x67   :  { %747 = vmatpush.bf16.msra.mxu1 %v2189_v27 }
  0x68   :  { %763 = vmatpush.bf16.msrb.mxu2 %v2245_v13 }
  0x69   :  { %738 = vmatpush.bf16.msrb.mxu0 %v2250_v15  ;;  %777 = vmatpush.bf16.msrb.mxu3 %v2255_v23 }
  0x6b   :  { %748 = vmatpush.bf16.msra.mxu1 %v2201_v39 }
  0x6c   :  { %764 = vmatpush.bf16.msrb.mxu2 %v2261_v33 }
  0x6d   :  { %739 = vmatpush.bf16.msrb.mxu0 %v2264_v34  ;;  %778 = vmatpush.bf16.msrb.mxu3 %v2267_v41 }
  0x6f   :  { %749 = vmatpush.bf16.msra.mxu1 %v2213_v53 }
  0x70   :  { %765 = vmatpush.bf16.msrb.mxu2 %v2271_v42 }
  0x71   :  { %740 = vmatpush.bf16.msrb.mxu0 %v2274_v47  ;;  %779 = vmatpush.bf16.msrb.mxu3 %v2280_v52 }
  0x73   :  { %750 = vmatpush.bf16.msra.mxu1 %v2252_v16 }
  0x74   :  { %766 = vmatpush.bf16.msrb.mxu2 %v2283_v55 }
  0x77   :  { %751 = vmatpush.bf16.msra.mxu1 %v2258_v28 }
  0x7b   :  { %752 = vmatpush.bf16.msra.mxu1 %v2291_v59 }
  0x7f   :  { %753 = vmatpush.bf16.msra.mxu1 %v2296_v2 }
  0x8f   :  { %v141_v4 = vpop.f32.mrf.mxu0  ;;  %v156_v5 = vpop.f32.mrf.mxu1 }
  0x90   :  { %v2376_v6 = vadd.f32 %v156_v5, %v2373_v3 }
  0x92   :  { %2709 = vst [vmem:[#allocation13_spill] sm:$0xff] %v2376_v6 }
  0x96   :  { %v2378_v7 = vpop.f32.mrf.mxu2 }
  0x97   :  { %v2380_v8 = vpop.f32.mrf.mxu3  ;;  %v143_v11 = vpop.f32.mrf.mxu0 }
  0x98   :  { %v2383_v12 = vadd.f32 %v143_v11, %v2373_v3  ;;  %v2385_v9 = vpop.f32.mrf.mxu1 }
  0x99   :  { %2710 = vst [vmem:[#allocation14_spill] sm:$0xff] %v2385_v9 }
  0x9e   :  { %v201_v21 = vpop.f32.mrf.mxu2 }
  0x9f   :  { %v2392_v22 = vadd.f32 %v201_v21, %v2387_v17  ;;  %v230_v24 = vpop.f32.mrf.mxu3  ;;  %v146_v25 = vpop.f32.mrf.mxu0 }
  0xa0   :  { %v2395_v29 = vadd.f32 %v230_v24, %v2389_v20  ;;  %v2398_v31 = vadd.f32 %v146_v25, %v2373_v3  ;;  %v2400_v35 = vpop.f32.mrf.mxu1 }
  0xa6   :  { %v204_v37 = vpop.f32.mrf.mxu2 }
  0xa7   :  { %v2405_v40 = vadd.f32 %v204_v37, %v2387_v17  ;;  %v233_v45 = vpop.f32.mrf.mxu3  ;;  %v148_v46 = vpop.f32.mrf.mxu0 }
  0xa8   :  { %v2408_v48 = vadd.f32 %v233_v45, %v2389_v20  ;;  %v2411_v49 = vadd.f32 %v148_v46, %v2373_v3  ;;  %v172_v51 = vpop.f32.mrf.mxu1 }
  0xa9   :  { %v2414_v56 = vadd.f32 %v172_v51, %v2402_v38 }
  0xae   :  { %v206_v58 = vpop.f32.mrf.mxu2 }
  0xaf   :  { %v2417_v61 = vadd.f32 %v206_v58, %v2387_v17  ;;  %v235_v62 = vpop.f32.mrf.mxu3  ;;  %v151_v60 = vpop.f32.mrf.mxu0 }
  0xb0   :  { %v2420_v10 = vadd.f32 %v235_v62, %v2389_v20  ;;  %v2423_v5 = vadd.f32 %v151_v60, %v2373_v3  ;;  %v175_v11 = vpop.f32.mrf.mxu1  ;;  %v142_v60 = vadd.f32 %v141_v4, %v2373_v3 }
  0xb1   :  { %2711 = vst [vmem:[#allocation15_spill] sm:$0xff] %v2417_v61  ;;  %v2426_v21 = vadd.f32 %v175_v11, %v2402_v38 }
  0xb2   :  { %2712 = vst [vmem:[#allocation16_spill] sm:$0xff] %v2420_v10 }
  0xb3   :  { %2713 = vst [vmem:[#allocation17_spill] sm:$0xff] %v2423_v5 }
  0xb6   :  { %v209_v24 = vpop.f32.mrf.mxu2 }
  0xb7   :  { %v2429_v25 = vadd.f32 %v209_v24, %v2387_v17  ;;  %v238_v37 = vpop.f32.mrf.mxu3  ;;  %v153_v45 = vpop.f32.mrf.mxu0 }
  0xb8   :  { %v2432_v46 = vadd.f32 %v238_v37, %v2389_v20  ;;  %v2435_v51 = vadd.f32 %v153_v45, %v2373_v3  ;;  %v177_v58 = vpop.f32.mrf.mxu1 }
  0xb9   :  { %2714 = vst [vmem:[#allocation18_spill] sm:$0xff] %v2429_v25  ;;  %v2438_v62 = vadd.f32 %v177_v58, %v2402_v38 }
  0xba   :  { %2715 = vst [vmem:[#allocation19_spill] sm:$0xff] %v2432_v46 }
  0xbb   :  { %2716 = vst [vmem:[#allocation20_spill] sm:$0xff] %v2435_v51 }
  0xbc   :  { %2717 = vst [vmem:[#allocation21_spill] sm:$0xff] %v2438_v62 }
  0xbe   :  { %v211_v11 = vpop.f32.mrf.mxu2 }
  0xbf   :  { %v2442_v9 = vadd.f32 %v211_v11, %v2387_v17  ;;  %v240_v24 = vpop.f32.mrf.mxu3  ;;  %v488_v6 = vpop.f32.mrf.mxu0 }
  0xc0   :  { %v2445_v25 = vadd.f32 %v240_v24, %v2389_v20  ;;  %v180_v37 = vpop.f32.mrf.mxu1  ;;  %v531_v46 = vadd.f32 %v488_v6, %v142_v60 }
  0xc1   :  { %2718 = vst [vmem:[#allocation22_spill] sm:$0xff] %v2442_v9  ;;  %v2448_v45 = vadd.f32 %v180_v37, %v2402_v38 }
  0xc2   :  { %2719 = vst [vmem:[#allocation23_spill] sm:$0xff] %v2445_v25  ;;  %v1771_v51 = vmul.f32 -1.442695, %v531_v46 }
  0xc3   :  { %2720 = vst [vmem:[#allocation24_spill] sm:$0xff] %v2448_v45 }
  0xc4   :  { %1885 = vpow2.f32 %v1771_v51 }
  0xc6   :  { %v214_v58 = vpop.f32.mrf.mxu2 }
  0xc7   :  { %v2451_v5 = vadd.f32 %v214_v58, %v2387_v17  ;;  %v243_v4 = vpop.f32.mrf.mxu3  ;;  %v490_v3 = vpop.f32.mrf.mxu0 }
  0xc8   :  { %v2454_v11 = vadd.f32 %v243_v4, %v2389_v20  ;;  %v182_v9 = vpop.f32.mrf.mxu1 }
  0xc9   :  { %2721 = vst [vmem:[#allocation25_spill] sm:$0xff] %v2451_v5  ;;  %v2457_v24 = vadd.f32 %v182_v9, %v2402_v38  ;;  %v200_v9 = vadd.f32 %v2378_v7, %v2387_v17 }
  0xca   :  { %2722 = vst [vmem:[#allocation26_spill] sm:$0xff] %v2454_v11  ;;  %v1886_v25 = vpop.eup %1885 }
  0xcb   :  { %2723 = vst [vmem:[#allocation27_spill] sm:$0xff] %v2457_v24  ;;  %v538_v6 = vadd.f32 1.0, %v1886_v25  ;;  %v229_v24 = vadd.f32 %v2380_v8, %v2389_v20 }
  0xcd   :  { %1887 = vrcp.f32 %v538_v6  ;;  %vm544_vm2 = vweird.f32 %v538_v6 }
  0xce   :  { %v216_v60 = vpop.f32.mrf.mxu2 }
  0xcf   :  { %v2460_v46 = vadd.f32 %v216_v60, %v2387_v17  ;;  %v245_v51 = vpop.f32.mrf.mxu3 }
  0xd0   :  { %v2463_v37 = vadd.f32 %v245_v51, %v2389_v20  ;;  %v185_v58 = vpop.f32.mrf.mxu1  ;;  %v548_v51 = vand.u32 2147483647, %v538_v6 }
  0xd1   :  { %2724 = vst [vmem:[#allocation28_spill] sm:$0xff] %v2460_v46  ;;  %v2466_v3 = vadd.f32 %v185_v58, %v2402_v38  ;;  %v550_v46 = vand.u32 2147483648, %v538_v6 }
  0xd2   :  { %2725 = vst [vmem:[#allocation29_spill] sm:$0xff] %v2463_v37  ;;  %vm549_vm4 = vcmp.eq.f32.partialorder %v548_v51, 8.507059e+37 }
  0xd3   :  { %2726 = vst [vmem:[#allocation30_spill] sm:$0xff] %v2466_v3  ;;  %v1888_v4 = vpop.eup %1887  ;;  %v551_v7 = vor.u32 1.1754944e-38, %v550_v46 }
  0xd4   :  { %v540_v5 = vmul.f32 %v1888_v4, %v538_v6  ;;  %vm545_vm1 = vweird.f32 %v1888_v4 }
  0xd5   :  { %vm546_vm3 = vmor %vm544_vm2, %vm545_vm1 }
  0xd6   :  { %v541_v11 = vsub.f32 1.0, %v540_v5  ;;  %v514_v25 = vpop.f32.mrf.mxu2 }
  0xd7   :  { %v533_v60 = vadd.f32 %v514_v25, %v200_v9  ;;  %v527_v45 = vpop.f32.mrf.mxu3 }
  0xd8   :  { %v542_v61 = vmul.f32 %v1888_v4, %v541_v11  ;;  %v187_v37 = vpop.f32.mrf.mxu1  ;;  %v534_v58 = vadd.f32 %v527_v45, %v229_v24  ;;  %v171_v11 = vadd.f32 %v2400_v35, %v2402_v38 }
  0xd9   :  { %1889 = vtanh.f32 %v533_v60  ;;  %v2473_v3 = vadd.f32 %v187_v37, %v2402_v38 }
  0xda   :  { %v543_v10 = vadd.f32 %v1888_v4, %v542_v61  ;;  %v1773_v8 = vmul.f32 -1.442695, %v534_v58 }
  0xdc   :  { %v547_v17 = vsel %vm546_vm3, %v1888_v4, %v543_v10  ;;  %1891 = vpow2.f32 %v1773_v8 }
  0xdd   :  { %v552_v5 = vsel %vm549_vm4, %v551_v7, %v547_v17 }
  0xde   :  { %v516_v20 = vpop.f32.mrf.mxu2 }
  0xdf   :  { %v1890_v9 = vpop.eup %1889  ;;  %v529_v25 = vpop.f32.mrf.mxu3 }
  0xe0   :  { %v594_v62 = vmul.f32 %v1890_v9, %v552_v5  ;;  %v501_v60 = vpop.f32.mrf.mxu1 }
  0xe1   :  { %v532_v45 = vadd.f32 %v501_v60, %v171_v11 }
  0xe2   :  { %v1892_v61 = vpop.eup %1891 }
  0xe3   :  { %v1772_v24 = vmul.f32 -1.442695, %v532_v45  ;;  %v577_v37 = vadd.f32 1.0, %v1892_v61 }
  0xe5   :  { %1893 = vpow2.f32 %v1772_v24  ;;  %vm583_vm10 = vweird.f32 %v577_v37 }
  0xe6   :  { %1895 = vrcp.f32 %v577_v37 }
  0xe8   :  { %v503_v6 = vpop.f32.mrf.mxu1 }
  0xe9   :  { %v589_v6 = vand.u32 2147483648, %v577_v37 }
  0xeb   :  { %v1894_v46 = vpop.eup %1893 }
  0xec   :  { %v557_v10 = vadd.f32 1.0, %v1894_v46  ;;  %v1896_v4 = vpop.eup %1895  ;;  %v587_v46 = vand.u32 2147483647, %v577_v37 }
  0xed   :  { %v579_v7 = vmul.f32 %v1896_v4, %v577_v37  ;;  %vm584_vm9 = vweird.f32 %v1896_v4 }
  0xee   :  { %1897 = vrcp.f32 %v557_v10  ;;  %v569_v35 = vand.u32 2147483648, %v557_v10  ;;  %v567_v5 = vand.u32 2147483647, %v557_v10  ;;  %vm563_vm6 = vweird.f32 %v557_v10  ;;  %vm585_vm11 = vmor %vm583_vm10, %vm584_vm9 }
  0xef   :  { %v580_v8 = vsub.f32 1.0, %v579_v7  ;;  %v590_v7 = vor.u32 1.1754944e-38, %v589_v6  ;;  %vm588_vm12 = vcmp.eq.f32.partialorder %v587_v46, 8.507059e+37 }
  0xf0   :  { %v570_v9 = vor.u32 1.1754944e-38, %v569_v35  ;;  %vm568_vm8 = vcmp.eq.f32.partialorder %v567_v5, 8.507059e+37 }
  0xf1   :  { %v581_v60 = vmul.f32 %v1896_v4, %v580_v8 }
  0xf3   :  { %v582_v61 = vadd.f32 %v1896_v4, %v581_v60 }
  0xf4   :  { %v1898_v51 = vpop.eup %1897 }
  0xf5   :  { %v559_v58 = vmul.f32 %v1898_v51, %v557_v10  ;;  %vm564_vm5 = vweird.f32 %v1898_v51 }
  0xf6   :  { %vm565_vm7 = vmor %vm563_vm6, %vm564_vm5 }
  0xf7   :  { %v560_v17 = vsub.f32 1.0, %v559_v58  ;;  %v586_v58 = vsel %vm585_vm11, %v1896_v4, %v582_v61 }
  0xf9   :  { %v561_v38 = vmul.f32 %v1898_v51, %v560_v17  ;;  %v591_v17 = vsel %vm588_vm12, %v590_v7, %v586_v58 }
  0xfb   :  { %v562_v20 = vadd.f32 %v1898_v51, %v561_v38 }
  0xfd   :  { %v566_v11 = vsel %vm565_vm7, %v1898_v51, %v562_v20 }
  0xfe   :  { %v571_v25 = vsel %vm568_vm8, %v570_v9, %v566_v11 }
  0xff   :  { %v593_v45 = vmul.f32 0.0, %v571_v25 }
 0x101   :  { %v2477_v24 = vadd.f32 %v594_v62, %v593_v45 }
 0x103   :  { %1899 = vtanh.f32 %v2477_v24 }
 0x109   :  { %v1900_v10 = vpop.eup %1899 }
 0x10a   :  { %v597_v51 = vmul.f32 %v1900_v10, %v591_v17 }
 0x10c   :  { %v605_v35 = vpack.c.bf16 %v597_v51, %v597_v51 }
 0x10e   :  { %614 = vmatmul.bf16.vlgmr.msra.gmra.mxu0 %v605_v35  ;;  %627 = vmatmul.bf16.vlgmr.msrb.gmra.mxu1 %v605_v35 }
 0x10f   :  { %640 = vmatmul.bf16.vlgmr.msra.gmra.mxu2 %v605_v35  ;;  %653 = vmatmul.bf16.vlgmr.msra.gmra.mxu3 %v605_v35 }
 0x110   :  { %860 = vmatpush.bf16.msra.mxu0 %v2176_v19  ;;  %873 = vmatpush.bf16.msrb.mxu1 %v2174_v18 }
 0x111   :  { %886 = vmatpush.bf16.msra.mxu2 %v2197_v36  ;;  %899 = vmatpush.bf16.msra.mxu3 %v2184_v26 }
 0x114   :  { %861 = vmatpush.bf16.msra.mxu0 %v2192_v30  ;;  %874 = vmatpush.bf16.msrb.mxu1 %v2189_v27 }
 0x115   :  { %887 = vmatpush.bf16.msra.mxu2 %v2207_v44  ;;  %900 = vmatpush.bf16.msra.mxu3 %v2195_v32 }
 0x118   :  { %862 = vmatpush.bf16.msra.mxu0 %v2204_v43  ;;  %875 = vmatpush.bf16.msrb.mxu1 %v2201_v39 }
 0x119   :  { %888 = vmatpush.bf16.msra.mxu2 %v2215_v54  ;;  %901 = vmatpush.bf16.msra.mxu3 %v2209_v50 }
 0x11c   :  { %863 = vmatpush.bf16.msra.mxu0 %v2218_v57  ;;  %876 = vmatpush.bf16.msrb.mxu1 %v2213_v53 }
 0x11d   :  { %889 = vmatpush.bf16.msra.mxu2 %v2230_v0  ;;  %902 = vmatpush.bf16.msra.mxu3 %v2226_v63 }
 0x120   :  { %864 = vmatpush.bf16.msra.mxu0 %v2233_v1  ;;  %877 = vmatpush.bf16.msrb.mxu1 %v2252_v16 }
 0x121   :  { %890 = vmatpush.bf16.msra.mxu2 %v2245_v13  ;;  %903 = vmatpush.bf16.msra.mxu3 %v2247_v14 }
 0x124   :  { %865 = vmatpush.bf16.msra.mxu0 %v2250_v15  ;;  %878 = vmatpush.bf16.msrb.mxu1 %v2258_v28 }
 0x125   :  { %891 = vmatpush.bf16.msra.mxu2 %v2261_v33  ;;  %904 = vmatpush.bf16.msra.mxu3 %v2255_v23 }
 0x128   :  { %866 = vmatpush.bf16.msra.mxu0 %v2264_v34  ;;  %879 = vmatpush.bf16.msrb.mxu1 %v2291_v59 }
 0x129   :  { %892 = vmatpush.bf16.msra.mxu2 %v2271_v42  ;;  %905 = vmatpush.bf16.msra.mxu3 %v2267_v41 }
 0x12c   :  { %867 = vmatpush.bf16.msra.mxu0 %v2274_v47  ;;  %880 = vmatpush.bf16.msrb.mxu1 %v2296_v2 }
 0x12d   :  { %893 = vmatpush.bf16.msra.mxu2 %v2283_v55  ;;  %906 = vmatpush.bf16.msra.mxu3 %v2280_v52 }
 0x18b   :  { %v615_v62 = vpop.f32.mrf.mxu0  ;;  %v628_v37 = vpop.f32.mrf.mxu1 }
 0x18c   :  { %v658_v4 = vadd.f32 %v615_v62, %v2383_v12  ;;  %v659_v38 = vadd.f32 %v628_v37, %v2414_v56 }
 0x18e   :  { %v1774_v5 = vmul.f32 -1.442695, %v658_v4  ;;  %v1775_v8 = vmul.f32 -1.442695, %v659_v38 }
 0x190   :  { %1901 = vpow2.f32 %v1774_v5 }
 0x191   :  { %1903 = vpow2.f32 %v1775_v8 }
 0x192   :  { %v641_v20 = vpop.f32.mrf.mxu2  ;;  %v654_v9 = vpop.f32.mrf.mxu3 }
 0x193   :  { %v661_v11 = vadd.f32 %v654_v9, %v2395_v29  ;;  %v617_v25 = vpop.f32.mrf.mxu0  ;;  %v630_v60 = vpop.f32.mrf.mxu1  ;;  %v660_v51 = vadd.f32 %v641_v20, %v2392_v22 }
 0x195   :  { %v1776_v45 = vmul.f32 -1.442695, %v661_v11 }
 0x196   :  { %v1902_v61 = vpop.eup %1901 }
 0x197   :  { %v1904_v6 = vpop.eup %1903  ;;  %v665_v46 = vadd.f32 1.0, %v1902_v61  ;;  %1905 = vpow2.f32 %v1776_v45 }
 0x198   :  { %v684_v58 = vadd.f32 1.0, %v1904_v6 }
 0x199   :  { %1907 = vrcp.f32 %v665_v46  ;;  %v677_v38 = vand.u32 2147483648, %v665_v46  ;;  %v675_v9 = vand.u32 2147483647, %v665_v46  ;;  %vm671_vm15 = vweird.f32 %v665_v46 }
 0x19a   :  { %1909 = vrcp.f32 %v684_v58  ;;  %v643_v12 = vpop.f32.mrf.mxu2  ;;  %v656_v56 = vpop.f32.mrf.mxu3  ;;  %v696_v5 = vand.u32 2147483648, %v684_v58  ;;  %v694_v25 = vand.u32 2147483647, %v684_v58  ;;  %vm690_vm0 = vweird.f32 %v684_v58 }
 0x19b   :  { %v678_v22 = vor.u32 1.1754944e-38, %v677_v38  ;;  %vm676_vm3 = vcmp.eq.f32.partialorder %v675_v9, 8.507059e+37 }
 0x19c   :  { %v697_v6 = vor.u32 1.1754944e-38, %v696_v5  ;;  %vm695_vm4 = vcmp.eq.f32.partialorder %v694_v25, 8.507059e+37 }
 0x19d   :  { %v1906_v7 = vpop.eup %1905 }
 0x19e   :  { %v704_v10 = vadd.f32 1.0, %v1906_v7 }
 0x19f   :  { %v1908_v17 = vpop.eup %1907 }
 0x1a0   :  { %v1910_v35 = vpop.eup %1909  ;;  %v667_v62 = vmul.f32 %v1908_v17, %v665_v46  ;;  %1911 = vrcp.f32 %v704_v10  ;;  %vm672_vm13 = vweird.f32 %v1908_v17  ;;  %v716_v38 = vand.u32 2147483648, %v704_v10 }
 0x1a1   :  { %v686_v29 = vmul.f32 %v1910_v35, %v684_v58  ;;  %1913 = vtanh.f32 %v660_v51  ;;  %vm691_vm14 = vweird.f32 %v1910_v35  ;;  %vm673_vm1 = vmor %vm671_vm15, %vm672_vm13  ;;  %vm710_vm6 = vweird.f32 %v704_v10 }
 0x1a2   :  { %v668_v37 = vsub.f32 1.0, %v667_v62  ;;  %vm692_vm2 = vmor %vm690_vm0, %vm691_vm14  ;;  %v717_v9 = vor.u32 1.1754944e-38, %v716_v38 }
 0x1a3   :  { %v687_v4 = vsub.f32 1.0, %v686_v29 }
 0x1a4   :  { %v669_v8 = vmul.f32 %v1908_v17, %v668_v37 }
 0x1a5   :  { %v688_v11 = vmul.f32 %v1910_v35, %v687_v4 }
 0x1a6   :  { %v1912_v60 = vpop.eup %1911  ;;  %v670_v45 = vadd.f32 %v1908_v17, %v669_v8 }
 0x1a7   :  { %v689_v20 = vadd.f32 %v1910_v35, %v688_v11  ;;  %v706_v61 = vmul.f32 %v1912_v60, %v704_v10  ;;  %v1914_v56 = vpop.eup %1913  ;;  %vm711_vm5 = vweird.f32 %v1912_v60 }
 0x1a8   :  { %v674_v12 = vsel %vm673_vm1, %v1908_v17, %v670_v45  ;;  %v714_v17 = vand.u32 2147483647, %v704_v10  ;;  %vm712_vm7 = vmor %vm710_vm6, %vm711_vm5 }
 0x1a9   :  { %v679_v7 = vsel %vm676_vm3, %v678_v22, %v674_v12  ;;  %v693_v51 = vsel %vm692_vm2, %v1910_v35, %v689_v20  ;;  %v707_v62 = vsub.f32 1.0, %v706_v61 }
 0x1aa   :  { %v698_v29 = vsel %vm695_vm4, %v697_v6, %v693_v51  ;;  %v721_v37 = vmul.f32 %v1914_v56, %v679_v7  ;;  %vm715_vm8 = vcmp.eq.f32.partialorder %v714_v17, 8.507059e+37 }
 0x1ab   :  { %v720_v4 = vmul.f32 %v698_v29, %v2477_v24  ;;  %v708_v8 = vmul.f32 %v1912_v60, %v707_v62 }
 0x1ad   :  { %v2517_v46 = vadd.f32 %v721_v37, %v720_v4  ;;  %v709_v58 = vadd.f32 %v1912_v60, %v708_v8 }
 0x1af   :  { %1915 = vtanh.f32 %v2517_v46  ;;  %v713_v5 = vsel %vm712_vm7, %v1912_v60, %v709_v58 }
 0x1b0   :  { %v718_v11 = vsel %vm715_vm8, %v717_v9, %v713_v5 }
 0x1b5   :  { %v1916_v35 = vpop.eup %1915 }
 0x1b6   :  { %v724_v25 = vmul.f32 %v1916_v35, %v718_v11 }
 0x1b8   :  { %v732_v45 = vpack.c.bf16 %v724_v25, %v724_v25 }
 0x1ba   :  { %741 = vmatmul.bf16.vlgmr.msrb.gmra.mxu0 %v732_v45  ;;  %754 = vmatmul.bf16.vlgmr.msra.gmra.mxu1 %v732_v45 }
 0x1bb   :  { %767 = vmatmul.bf16.vlgmr.msrb.gmra.mxu2 %v732_v45  ;;  %780 = vmatmul.bf16.vlgmr.msrb.gmra.mxu3 %v732_v45 }
 0x1bc   :  { %987 = vmatpush.bf16.msrb.mxu0 %v2176_v19  ;;  %1000 = vmatpush.bf16.msra.mxu1 %v2174_v18 }
 0x1bd   :  { %1013 = vmatpush.bf16.msrb.mxu2 %v2197_v36  ;;  %1026 = vmatpush.bf16.msrb.mxu3 %v2184_v26 }
 0x1c0   :  { %988 = vmatpush.bf16.msrb.mxu0 %v2192_v30  ;;  %1001 = vmatpush.bf16.msra.mxu1 %v2189_v27 }
 0x1c1   :  { %1014 = vmatpush.bf16.msrb.mxu2 %v2207_v44  ;;  %1027 = vmatpush.bf16.msrb.mxu3 %v2195_v32 }
 0x1c4   :  { %989 = vmatpush.bf16.msrb.mxu0 %v2204_v43  ;;  %1002 = vmatpush.bf16.msra.mxu1 %v2201_v39 }
 0x1c5   :  { %1015 = vmatpush.bf16.msrb.mxu2 %v2215_v54  ;;  %1028 = vmatpush.bf16.msrb.mxu3 %v2209_v50 }
 0x1c8   :  { %990 = vmatpush.bf16.msrb.mxu0 %v2218_v57  ;;  %1003 = vmatpush.bf16.msra.mxu1 %v2213_v53 }
 0x1c9   :  { %1016 = vmatpush.bf16.msrb.mxu2 %v2230_v0  ;;  %1029 = vmatpush.bf16.msrb.mxu3 %v2226_v63 }
 0x1cc   :  { %991 = vmatpush.bf16.msrb.mxu0 %v2233_v1  ;;  %1004 = vmatpush.bf16.msra.mxu1 %v2252_v16 }
 0x1cd   :  { %1017 = vmatpush.bf16.msrb.mxu2 %v2245_v13  ;;  %1030 = vmatpush.bf16.msrb.mxu3 %v2247_v14 }
 0x1d0   :  { %992 = vmatpush.bf16.msrb.mxu0 %v2250_v15  ;;  %1005 = vmatpush.bf16.msra.mxu1 %v2258_v28 }
 0x1d1   :  { %1018 = vmatpush.bf16.msrb.mxu2 %v2261_v33  ;;  %1031 = vmatpush.bf16.msrb.mxu3 %v2255_v23 }
 0x1d4   :  { %993 = vmatpush.bf16.msrb.mxu0 %v2264_v34  ;;  %1006 = vmatpush.bf16.msra.mxu1 %v2291_v59 }
 0x1d5   :  { %1019 = vmatpush.bf16.msrb.mxu2 %v2271_v42  ;;  %1032 = vmatpush.bf16.msrb.mxu3 %v2267_v41 }
 0x1d8   :  { %994 = vmatpush.bf16.msrb.mxu0 %v2274_v47  ;;  %1007 = vmatpush.bf16.msra.mxu1 %v2296_v2 }
 0x1d9   :  { %1020 = vmatpush.bf16.msrb.mxu2 %v2283_v55  ;;  %1033 = vmatpush.bf16.msrb.mxu3 %v2280_v52 }
 0x237   :  { %v742_v24 = vpop.f32.mrf.mxu0  ;;  %v755_v10 = vpop.f32.mrf.mxu1 }
 0x238   :  { %v785_v60 = vadd.f32 %v742_v24, %v2398_v31  ;;  %v786_v22 = vadd.f32 %v755_v10, %v2426_v21 }
 0x23a   :  { %v1777_v20 = vmul.f32 -1.442695, %v785_v60  ;;  %v1778_v61 = vmul.f32 -1.442695, %v786_v22 }
 0x23c   :  { %1917 = vpow2.f32 %v1777_v20 }
 0x23d   :  { %1919 = vpow2.f32 %v1778_v61 }
 0x23e   :  { %v768_v6 = vpop.f32.mrf.mxu2  ;;  %v781_v12 = vpop.f32.mrf.mxu3 }
 0x23f   :  { %v788_v56 = vadd.f32 %v781_v12, %v2408_v48  ;;  %v744_v7 = vpop.f32.mrf.mxu0  ;;  %v757_v51 = vpop.f32.mrf.mxu1  ;;  %v787_v5 = vadd.f32 %v768_v6, %v2405_v40 }
 0x241   :  { %v1779_v62 = vmul.f32 -1.442695, %v788_v56 }
 0x242   :  { %v1918_v29 = vpop.eup %1917 }
 0x243   :  { %v1920_v37 = vpop.eup %1919  ;;  %v792_v4 = vadd.f32 1.0, %v1918_v29  ;;  %1921 = vpow2.f32 %v1779_v62 }
 0x244   :  { %v811_v8 = vadd.f32 1.0, %v1920_v37 }
 0x245   :  { %1923 = vrcp.f32 %v792_v4  ;;  %v804_v45 = vand.u32 2147483648, %v792_v4  ;;  %v802_v60 = vand.u32 2147483647, %v792_v4  ;;  %vm798_vm11 = vweird.f32 %v792_v4 }
 0x246   :  { %1925 = vrcp.f32 %v811_v8  ;;  %v770_v31 = vpop.f32.mrf.mxu2  ;;  %v783_v21 = vpop.f32.mrf.mxu3  ;;  %v823_v24 = vand.u32 2147483648, %v811_v8  ;;  %v821_v20 = vand.u32 2147483647, %v811_v8  ;;  %vm817_vm12 = vweird.f32 %v811_v8 }
 0x247   :  { %v805_v40 = vor.u32 1.1754944e-38, %v804_v45  ;;  %vm803_vm15 = vcmp.eq.f32.partialorder %v802_v60, 8.507059e+37 }
 0x248   :  { %v824_v7 = vor.u32 1.1754944e-38, %v823_v24  ;;  %vm822_vm0 = vcmp.eq.f32.partialorder %v821_v20, 8.507059e+37 }
 0x249   :  { %v1922_v58 = vpop.eup %1921 }
 0x24a   :  { %v831_v38 = vadd.f32 1.0, %v1922_v58 }
 0x24b   :  { %v1924_v17 = vpop.eup %1923 }
 0x24c   :  { %v1926_v9 = vpop.eup %1925  ;;  %v794_v35 = vmul.f32 %v1924_v17, %v792_v4  ;;  %1927 = vrcp.f32 %v831_v38  ;;  %vm799_vm9 = vweird.f32 %v1924_v17  ;;  %vm837_vm2 = vweird.f32 %v831_v38 }
 0x24d   :  { %v813_v48 = vmul.f32 %v1926_v9, %v811_v8  ;;  %1929 = vtanh.f32 %v787_v5  ;;  %vm818_vm10 = vweird.f32 %v1926_v9  ;;  %vm800_vm13 = vmor %vm798_vm11, %vm799_vm9 }
 0x24e   :  { %v795_v11 = vsub.f32 1.0, %v794_v35  ;;  %vm819_vm14 = vmor %vm817_vm12, %vm818_vm10 }
 0x24f   :  { %v814_v25 = vsub.f32 1.0, %v813_v48  ;;  %v843_v48 = vand.u32 2147483648, %v831_v38 }
 0x250   :  { %v796_v10 = vmul.f32 %v1924_v17, %v795_v11 }
 0x251   :  { %v815_v22 = vmul.f32 %v1926_v9, %v814_v25  ;;  %v844_v25 = vor.u32 1.1754944e-38, %v843_v48 }
 0x252   :  { %v1928_v61 = vpop.eup %1927  ;;  %v797_v12 = vadd.f32 %v1924_v17, %v796_v10 }
 0x253   :  { %v816_v6 = vadd.f32 %v1926_v9, %v815_v22  ;;  %v833_v56 = vmul.f32 %v1928_v61, %v831_v38  ;;  %v1930_v62 = vpop.eup %1929  ;;  %vm838_vm1 = vweird.f32 %v1928_v61  ;;  %v2727_v22 = vld [vmem:[#allocation21_spill] sm:$0xff] }
 0x254   :  { %v801_v51 = vsel %vm800_vm13, %v1924_v17, %v797_v12  ;;  %v841_v17 = vand.u32 2147483647, %v831_v38  ;;  %vm839_vm3 = vmor %vm837_vm2, %vm838_vm1 }
 0x255   :  { %v806_v29 = vsel %vm803_vm15, %v805_v40, %v801_v51  ;;  %v820_v37 = vsel %vm819_vm14, %v1926_v9, %v816_v6  ;;  %v834_v31 = vsub.f32 1.0, %v833_v56  ;;  %v2728_v56 = vld [vmem:[#allocation16_spill] sm:$0xff] }
 0x256   :  { %v825_v21 = vsel %vm822_vm0, %v824_v7, %v820_v37  ;;  %v848_v58 = vmul.f32 %v1930_v62, %v806_v29  ;;  %vm842_vm4 = vcmp.eq.f32.partialorder %v841_v17, 8.507059e+37  ;;  %v2729_v17 = vld [vmem:[#allocation15_spill] sm:$0xff] }
 0x257   :  { %v847_v5 = vmul.f32 %v825_v21, %v2517_v46  ;;  %v835_v35 = vmul.f32 %v1928_v61, %v834_v31 }
 0x259   :  { %v2557_v4 = vadd.f32 %v848_v58, %v847_v5  ;;  %v836_v8 = vadd.f32 %v1928_v61, %v835_v35 }
 0x25b   :  { %1931 = vtanh.f32 %v2557_v4  ;;  %v840_v11 = vsel %vm839_vm3, %v1928_v61, %v836_v8 }
 0x25c   :  { %v845_v45 = vsel %vm842_vm4, %v844_v25, %v840_v11 }
 0x261   :  { %v1932_v9 = vpop.eup %1931 }
 0x262   :  { %v851_v24 = vmul.f32 %v1932_v9, %v845_v45 }
 0x264   :  { %v859_v10 = vpack.c.bf16 %v851_v24, %v851_v24 }
 0x266   :  { %868 = vmatmul.bf16.vlgmr.msra.gmra.mxu0 %v859_v10  ;;  %881 = vmatmul.bf16.vlgmr.msrb.gmra.mxu1 %v859_v10 }
 0x267   :  { %894 = vmatmul.bf16.vlgmr.msra.gmra.mxu2 %v859_v10  ;;  %907 = vmatmul.bf16.vlgmr.msra.gmra.mxu3 %v859_v10 }
 0x268   :  { %1114 = vmatpush.bf16.msra.mxu0 %v2176_v19  ;;  %1127 = vmatpush.bf16.msrb.mxu1 %v2174_v18 }
 0x269   :  { %1140 = vmatpush.bf16.msra.mxu2 %v2197_v36  ;;  %1153 = vmatpush.bf16.msra.mxu3 %v2184_v26 }
 0x26c   :  { %1115 = vmatpush.bf16.msra.mxu0 %v2192_v30  ;;  %1128 = vmatpush.bf16.msrb.mxu1 %v2189_v27 }
 0x26d   :  { %1141 = vmatpush.bf16.msra.mxu2 %v2207_v44  ;;  %1154 = vmatpush.bf16.msra.mxu3 %v2195_v32 }
 0x270   :  { %1116 = vmatpush.bf16.msra.mxu0 %v2204_v43  ;;  %1129 = vmatpush.bf16.msrb.mxu1 %v2201_v39 }
 0x271   :  { %1142 = vmatpush.bf16.msra.mxu2 %v2215_v54  ;;  %1155 = vmatpush.bf16.msra.mxu3 %v2209_v50 }
 0x274   :  { %1117 = vmatpush.bf16.msra.mxu0 %v2218_v57  ;;  %1130 = vmatpush.bf16.msrb.mxu1 %v2213_v53 }
 0x275   :  { %1143 = vmatpush.bf16.msra.mxu2 %v2230_v0  ;;  %1156 = vmatpush.bf16.msra.mxu3 %v2226_v63 }
 0x278   :  { %1118 = vmatpush.bf16.msra.mxu0 %v2233_v1  ;;  %1131 = vmatpush.bf16.msrb.mxu1 %v2252_v16 }
 0x279   :  { %1144 = vmatpush.bf16.msra.mxu2 %v2245_v13  ;;  %1157 = vmatpush.bf16.msra.mxu3 %v2247_v14 }
 0x27c   :  { %1119 = vmatpush.bf16.msra.mxu0 %v2250_v15  ;;  %1132 = vmatpush.bf16.msrb.mxu1 %v2258_v28 }
 0x27d   :  { %1145 = vmatpush.bf16.msra.mxu2 %v2261_v33  ;;  %1158 = vmatpush.bf16.msra.mxu3 %v2255_v23 }
 0x280   :  { %1120 = vmatpush.bf16.msra.mxu0 %v2264_v34  ;;  %1133 = vmatpush.bf16.msrb.mxu1 %v2291_v59 }
 0x281   :  { %1146 = vmatpush.bf16.msra.mxu2 %v2271_v42  ;;  %1159 = vmatpush.bf16.msra.mxu3 %v2267_v41 }
 0x284   :  { %1121 = vmatpush.bf16.msra.mxu0 %v2274_v47  ;;  %1134 = vmatpush.bf16.msrb.mxu1 %v2296_v2 }
 0x285   :  { %1147 = vmatpush.bf16.msra.mxu2 %v2283_v55  ;;  %1160 = vmatpush.bf16.msra.mxu3 %v2280_v52 }
 0x2e3   :  { %v869_v46 = vpop.f32.mrf.mxu0  ;;  %v882_v38 = vpop.f32.mrf.mxu1 }
 0x2e4   :  { %v912_v60 = vadd.f32 %v869_v46, %v2411_v49  ;;  %v913_v20 = vadd.f32 %v882_v38, %v2727_v22 }
 0x2e6   :  { %v1780_v61 = vmul.f32 -1.442695, %v912_v60  ;;  %v1781_v12 = vmul.f32 -1.442695, %v913_v20 }
 0x2e8   :  { %1933 = vpow2.f32 %v1780_v61 }
 0x2e9   :  { %1935 = vpow2.f32 %v1781_v12 }
 0x2ea   :  { %v895_v40 = vpop.f32.mrf.mxu2  ;;  %v908_v6 = vpop.f32.mrf.mxu3 }
 0x2eb   :  { %v915_v7 = vadd.f32 %v908_v6, %v2728_v56  ;;  %v871_v51 = vpop.f32.mrf.mxu0  ;;  %v884_v62 = vpop.f32.mrf.mxu1  ;;  %v914_v11 = vadd.f32 %v895_v40, %v2729_v17 }
 0x2ed   :  { %v1782_v29 = vmul.f32 -1.442695, %v915_v7 }
 0x2ee   :  { %v1934_v37 = vpop.eup %1933 }
 0x2ef   :  { %v1936_v31 = vpop.eup %1935  ;;  %v919_v21 = vadd.f32 1.0, %v1934_v37  ;;  %1937 = vpow2.f32 %v1782_v29 }
 0x2f0   :  { %v938_v58 = vadd.f32 1.0, %v1936_v31 }
 0x2f1   :  { %1939 = vrcp.f32 %v919_v21  ;;  %v931_v46 = vand.u32 2147483648, %v919_v21  ;;  %v929_v22 = vand.u32 2147483647, %v919_v21  ;;  %vm925_vm7 = vweird.f32 %v919_v21 }
 0x2f2   :  { %1941 = vrcp.f32 %v938_v58  ;;  %v897_v49 = vpop.f32.mrf.mxu2  ;;  %v910_v5 = vpop.f32.mrf.mxu3  ;;  %v950_v38 = vand.u32 2147483648, %v938_v58  ;;  %v948_v61 = vand.u32 2147483647, %v938_v58  ;;  %vm944_vm8 = vweird.f32 %v938_v58 }
 0x2f3   :  { %v932_v40 = vor.u32 1.1754944e-38, %v931_v46  ;;  %vm930_vm11 = vcmp.eq.f32.partialorder %v929_v22, 8.507059e+37 }
 0x2f4   :  { %v951_v51 = vor.u32 1.1754944e-38, %v950_v38  ;;  %vm949_vm12 = vcmp.eq.f32.partialorder %v948_v61, 8.507059e+37 }
 0x2f5   :  { %v1938_v35 = vpop.eup %1937 }
 0x2f6   :  { %v958_v8 = vadd.f32 1.0, %v1938_v35 }
 0x2f7   :  { %v1940_v48 = vpop.eup %1939 }
 0x2f8   :  { %v1942_v25 = vpop.eup %1941  ;;  %v921_v9 = vmul.f32 %v1940_v48, %v919_v21  ;;  %1943 = vrcp.f32 %v958_v8  ;;  %vm926_vm5 = vweird.f32 %v1940_v48  ;;  %vm964_vm14 = vweird.f32 %v958_v8 }
 0x2f9   :  { %v940_v45 = vmul.f32 %v1942_v25, %v938_v58  ;;  %1945 = vtanh.f32 %v914_v11  ;;  %vm945_vm6 = vweird.f32 %v1942_v25  ;;  %vm927_vm9 = vmor %vm925_vm7, %vm926_vm5 }
 0x2fa   :  { %v922_v24 = vsub.f32 1.0, %v921_v9  ;;  %vm946_vm10 = vmor %vm944_vm8, %vm945_vm6  ;;  %v970_v9 = vand.u32 2147483648, %v958_v8 }
 0x2fb   :  { %v941_v10 = vsub.f32 1.0, %v940_v45 }
 0x2fc   :  { %v923_v60 = vmul.f32 %v1940_v48, %v922_v24  ;;  %v971_v24 = vor.u32 1.1754944e-38, %v970_v9 }
 0x2fd   :  { %v942_v20 = vmul.f32 %v1942_v25, %v941_v10 }
 0x2fe   :  { %v1944_v12 = vpop.eup %1943  ;;  %v924_v6 = vadd.f32 %v1940_v48, %v923_v60  ;;  %v2730_v60 = vld [vmem:[#allocation17_spill] sm:$0xff] }
 0x2ff   :  { %v943_v56 = vadd.f32 %v1942_v25, %v942_v20  ;;  %v960_v7 = vmul.f32 %v1944_v12, %v958_v8  ;;  %v1946_v29 = vpop.eup %1945  ;;  %vm965_vm13 = vweird.f32 %v1944_v12  ;;  %v2731_v20 = vld [vmem:[#allocation24_spill] sm:$0xff] }
 0x300   :  { %v928_v62 = vsel %vm927_vm9, %v1940_v48, %v924_v6  ;;  %v968_v48 = vand.u32 2147483647, %v958_v8  ;;  %vm966_vm15 = vmor %vm964_vm14, %vm965_vm13 }
 0x301   :  { %v933_v37 = vsel %vm930_vm11, %v932_v40, %v928_v62  ;;  %v947_v31 = vsel %vm946_vm10, %v1942_v25, %v943_v56  ;;  %v961_v49 = vsub.f32 1.0, %v960_v7  ;;  %v2732_v7 = vld [vmem:[#allocation19_spill] sm:$0xff] }
 0x302   :  { %v952_v5 = vsel %vm949_vm12, %v951_v51, %v947_v31  ;;  %v975_v35 = vmul.f32 %v1946_v29, %v933_v37  ;;  %vm969_vm0 = vcmp.eq.f32.partialorder %v968_v48, 8.507059e+37 }
 0x303   :  { %v974_v17 = vmul.f32 %v952_v5, %v2557_v4  ;;  %v962_v11 = vmul.f32 %v1944_v12, %v961_v49 }
 0x305   :  { %v2597_v21 = vadd.f32 %v975_v35, %v974_v17  ;;  %v963_v58 = vadd.f32 %v1944_v12, %v962_v11 }
 0x307   :  { %1947 = vtanh.f32 %v2597_v21  ;;  %v967_v45 = vsel %vm966_vm15, %v1944_v12, %v963_v58 }
 0x308   :  { %v972_v10 = vsel %vm969_vm0, %v971_v24, %v967_v45  ;;  %v2733_v45 = vld [vmem:[#allocation18_spill] sm:$0xff] }
 0x30d   :  { %v1948_v25 = vpop.eup %1947 }
 0x30e   :  { %v978_v46 = vmul.f32 %v1948_v25, %v972_v10 }
 0x310   :  { %v986_v38 = vpack.c.bf16 %v978_v46, %v978_v46 }
 0x312   :  { %995 = vmatmul.bf16.vlgmr.msrb.gmra.mxu0 %v986_v38  ;;  %1008 = vmatmul.bf16.vlgmr.msra.gmra.mxu1 %v986_v38 }
 0x313   :  { %1021 = vmatmul.bf16.vlgmr.msrb.gmra.mxu2 %v986_v38  ;;  %1034 = vmatmul.bf16.vlgmr.msrb.gmra.mxu3 %v986_v38 }
 0x314   :  { %1241 = vmatpush.bf16.msrb.mxu0 %v2176_v19  ;;  %1254 = vmatpush.bf16.msra.mxu1 %v2174_v18 }
 0x315   :  { %1267 = vmatpush.bf16.msrb.mxu2 %v2197_v36  ;;  %1280 = vmatpush.bf16.msrb.mxu3 %v2184_v26 }
 0x318   :  { %1242 = vmatpush.bf16.msrb.mxu0 %v2192_v30  ;;  %1255 = vmatpush.bf16.msra.mxu1 %v2189_v27 }
 0x319   :  { %1268 = vmatpush.bf16.msrb.mxu2 %v2207_v44  ;;  %1281 = vmatpush.bf16.msrb.mxu3 %v2195_v32 }
 0x31c   :  { %1243 = vmatpush.bf16.msrb.mxu0 %v2204_v43  ;;  %1256 = vmatpush.bf16.msra.mxu1 %v2201_v39 }
 0x31d   :  { %1269 = vmatpush.bf16.msrb.mxu2 %v2215_v54  ;;  %1282 = vmatpush.bf16.msrb.mxu3 %v2209_v50 }
 0x320   :  { %1244 = vmatpush.bf16.msrb.mxu0 %v2218_v57  ;;  %1257 = vmatpush.bf16.msra.mxu1 %v2213_v53 }
 0x321   :  { %1270 = vmatpush.bf16.msrb.mxu2 %v2230_v0  ;;  %1283 = vmatpush.bf16.msrb.mxu3 %v2226_v63 }
 0x324   :  { %1245 = vmatpush.bf16.msrb.mxu0 %v2233_v1  ;;  %1258 = vmatpush.bf16.msra.mxu1 %v2252_v16 }
 0x325   :  { %1271 = vmatpush.bf16.msrb.mxu2 %v2245_v13  ;;  %1284 = vmatpush.bf16.msrb.mxu3 %v2247_v14 }
 0x328   :  { %1246 = vmatpush.bf16.msrb.mxu0 %v2250_v15  ;;  %1259 = vmatpush.bf16.msra.mxu1 %v2258_v28 }
 0x329   :  { %1272 = vmatpush.bf16.msrb.mxu2 %v2261_v33  ;;  %1285 = vmatpush.bf16.msrb.mxu3 %v2255_v23 }
 0x32c   :  { %1247 = vmatpush.bf16.msrb.mxu0 %v2264_v34  ;;  %1260 = vmatpush.bf16.msra.mxu1 %v2291_v59 }
 0x32d   :  { %1273 = vmatpush.bf16.msrb.mxu2 %v2271_v42  ;;  %1286 = vmatpush.bf16.msrb.mxu3 %v2267_v41 }
 0x330   :  { %1248 = vmatpush.bf16.msrb.mxu0 %v2274_v47  ;;  %1261 = vmatpush.bf16.msra.mxu1 %v2296_v2 }
 0x331   :  { %1274 = vmatpush.bf16.msrb.mxu2 %v2283_v55  ;;  %1287 = vmatpush.bf16.msrb.mxu3 %v2280_v52 }
 0x38f   :  { %v996_v4 = vpop.f32.mrf.mxu0  ;;  %v1009_v8 = vpop.f32.mrf.mxu1 }
 0x390   :  { %v1039_v22 = vadd.f32 %v996_v4, %v2730_v60  ;;  %v1040_v61 = vadd.f32 %v1009_v8, %v2731_v20 }
 0x392   :  { %v1783_v12 = vmul.f32 -1.442695, %v1039_v22  ;;  %v1784_v6 = vmul.f32 -1.442695, %v1040_v61 }
 0x394   :  { %1949 = vpow2.f32 %v1783_v12 }
 0x395   :  { %1951 = vpow2.f32 %v1784_v6 }
 0x396   :  { %v1022_v40 = vpop.f32.mrf.mxu2  ;;  %v1035_v56 = vpop.f32.mrf.mxu3 }
 0x397   :  { %v1042_v51 = vadd.f32 %v1035_v56, %v2732_v7  ;;  %v998_v62 = vpop.f32.mrf.mxu0  ;;  %v1011_v29 = vpop.f32.mrf.mxu1  ;;  %v1041_v24 = vadd.f32 %v1022_v40, %v2733_v45 }
 0x399   :  { %v1785_v37 = vmul.f32 -1.442695, %v1042_v51 }
 0x39a   :  { %v1950_v31 = vpop.eup %1949 }
 0x39b   :  { %v1952_v49 = vpop.eup %1951  ;;  %v1046_v5 = vadd.f32 1.0, %v1950_v31  ;;  %1953 = vpow2.f32 %v1785_v37 }
 0x39c   :  { %v1065_v35 = vadd.f32 1.0, %v1952_v49 }
 0x39d   :  { %1955 = vrcp.f32 %v1046_v5  ;;  %v1058_v8 = vand.u32 2147483648, %v1046_v5  ;;  %v1056_v20 = vand.u32 2147483647, %v1046_v5  ;;  %vm1052_vm3 = vweird.f32 %v1046_v5 }
 0x39e   :  { %1957 = vrcp.f32 %v1065_v35  ;;  %v1024_v17 = vpop.f32.mrf.mxu2  ;;  %v1037_v11 = vpop.f32.mrf.mxu3  ;;  %v1077_v60 = vand.u32 2147483648, %v1065_v35  ;;  %v1075_v12 = vand.u32 2147483647, %v1065_v35  ;;  %vm1071_vm4 = vweird.f32 %v1065_v35 }
 0x39f   :  { %v1059_v40 = vor.u32 1.1754944e-38, %v1058_v8  ;;  %vm1057_vm7 = vcmp.eq.f32.partialorder %v1056_v20, 8.507059e+37 }
 0x3a0   :  { %v1078_v62 = vor.u32 1.1754944e-38, %v1077_v60  ;;  %vm1076_vm8 = vcmp.eq.f32.partialorder %v1075_v12, 8.507059e+37 }
 0x3a1   :  { %v1954_v58 = vpop.eup %1953 }
 0x3a2   :  { %v1085_v9 = vadd.f32 1.0, %v1954_v58 }
 0x3a3   :  { %v1956_v48 = vpop.eup %1955 }
 0x3a4   :  { %v1958_v25 = vpop.eup %1957  ;;  %v1048_v10 = vmul.f32 %v1956_v48, %v1046_v5  ;;  %1959 = vrcp.f32 %v1085_v9  ;;  %vm1053_vm1 = vweird.f32 %v1956_v48  ;;  %vm1091_vm10 = vweird.f32 %v1085_v9 }
 0x3a5   :  { %v1067_v46 = vmul.f32 %v1958_v25, %v1065_v35  ;;  %1961 = vtanh.f32 %v1041_v24  ;;  %vm1072_vm2 = vweird.f32 %v1958_v25  ;;  %vm1054_vm5 = vmor %vm1052_vm3, %vm1053_vm1 }
 0x3a6   :  { %v1049_v38 = vsub.f32 1.0, %v1048_v10  ;;  %vm1073_vm6 = vmor %vm1071_vm4, %vm1072_vm2  ;;  %v1097_v10 = vand.u32 2147483648, %v1085_v9 }
 0x3a7   :  { %v1068_v4 = vsub.f32 1.0, %v1067_v46 }
 0x3a8   :  { %v1050_v22 = vmul.f32 %v1956_v48, %v1049_v38  ;;  %v1098_v38 = vor.u32 1.1754944e-38, %v1097_v10 }
 0x3a9   :  { %v1069_v61 = vmul.f32 %v1958_v25, %v1068_v4 }
 0x3aa   :  { %v1960_v6 = vpop.eup %1959  ;;  %v1051_v56 = vadd.f32 %v1956_v48, %v1050_v22 }
 0x3ab   :  { %v1070_v7 = vadd.f32 %v1958_v25, %v1069_v61  ;;  %v1087_v51 = vmul.f32 %v1960_v6, %v1085_v9  ;;  %v1962_v37 = vpop.eup %1961  ;;  %vm1092_vm9 = vweird.f32 %v1960_v6 }
 0x3ac   :  { %v1055_v29 = vsel %vm1054_vm5, %v1956_v48, %v1051_v56  ;;  %v1095_v48 = vand.u32 2147483647, %v1085_v9  ;;  %vm1093_vm11 = vmor %vm1091_vm10, %vm1092_vm9 }
 0x3ad   :  { %v1060_v31 = vsel %vm1057_vm7, %v1059_v40, %v1055_v29  ;;  %v1074_v49 = vsel %vm1073_vm6, %v1958_v25, %v1070_v7  ;;  %v1088_v17 = vsub.f32 1.0, %v1087_v51 }
 0x3ae   :  { %v1079_v11 = vsel %vm1076_vm8, %v1078_v62, %v1074_v49  ;;  %v1102_v58 = vmul.f32 %v1962_v37, %v1060_v31  ;;  %vm1096_vm12 = vcmp.eq.f32.partialorder %v1095_v48, 8.507059e+37 }
 0x3af   :  { %v1101_v45 = vmul.f32 %v1079_v11, %v2597_v21  ;;  %v1089_v24 = vmul.f32 %v1960_v6, %v1088_v17 }
 0x3b1   :  { %v2637_v5 = vadd.f32 %v1102_v58, %v1101_v45  ;;  %v1090_v35 = vadd.f32 %v1960_v6, %v1089_v24 }
 0x3b3   :  { %1963 = vtanh.f32 %v2637_v5  ;;  %v1094_v46 = vsel %vm1093_vm11, %v1960_v6, %v1090_v35 }
 0x3b4   :  { %v1099_v4 = vsel %vm1096_vm12, %v1098_v38, %v1094_v46 }
 0x3b9   :  { %v1964_v25 = vpop.eup %1963 }
 0x3ba   :  { %v1105_v8 = vmul.f32 %v1964_v25, %v1099_v4 }
 0x3bc   :  { %v1113_v60 = vpack.c.bf16 %v1105_v8, %v1105_v8 }
 0x3be   :  { %1122 = vmatmul.bf16.vlgmr.msra.gmra.mxu0 %v1113_v60  ;;  %1135 = vmatmul.bf16.vlgmr.msrb.gmra.mxu1 %v1113_v60 }
 0x3bf   :  { %1148 = vmatmul.bf16.vlgmr.msra.gmra.mxu2 %v1113_v60  ;;  %1161 = vmatmul.bf16.vlgmr.msra.gmra.mxu3 %v1113_v60 }
 0x3c0   :  { %1368 = vmatpush.bf16.msra.mxu0 %v2176_v19  ;;  %1381 = vmatpush.bf16.msrb.mxu1 %v2174_v18 }
 0x3c1   :  { %1394 = vmatpush.bf16.msra.mxu2 %v2197_v36  ;;  %1407 = vmatpush.bf16.msra.mxu3 %v2184_v26  ;;  %v2734_v26 = vld [vmem:[#allocation20_spill] sm:$0xff] }
 0x3c4   :  { %1369 = vmatpush.bf16.msra.mxu0 %v2192_v30  ;;  %1382 = vmatpush.bf16.msrb.mxu1 %v2189_v27  ;;  %v2735_v30 = vld [vmem:[#allocation27_spill] sm:$0xff] }
 0x3c5   :  { %1395 = vmatpush.bf16.msra.mxu2 %v2207_v44  ;;  %1408 = vmatpush.bf16.msra.mxu3 %v2195_v32 }
 0x3c8   :  { %1370 = vmatpush.bf16.msra.mxu0 %v2204_v43  ;;  %1383 = vmatpush.bf16.msrb.mxu1 %v2201_v39 }
 0x3c9   :  { %1396 = vmatpush.bf16.msra.mxu2 %v2215_v54  ;;  %1409 = vmatpush.bf16.msra.mxu3 %v2209_v50  ;;  %v2736_v50 = vld [vmem:[#allocation23_spill] sm:$0xff] }
 0x3cc   :  { %1371 = vmatpush.bf16.msra.mxu0 %v2218_v57  ;;  %1384 = vmatpush.bf16.msrb.mxu1 %v2213_v53 }
 0x3cd   :  { %1397 = vmatpush.bf16.msra.mxu2 %v2230_v0  ;;  %1410 = vmatpush.bf16.msra.mxu3 %v2226_v63 }
 0x3d0   :  { %1372 = vmatpush.bf16.msra.mxu0 %v2233_v1  ;;  %1385 = vmatpush.bf16.msrb.mxu1 %v2252_v16 }
 0x3d1   :  { %1398 = vmatpush.bf16.msra.mxu2 %v2245_v13  ;;  %1411 = vmatpush.bf16.msra.mxu3 %v2247_v14 }
 0x3d4   :  { %1373 = vmatpush.bf16.msra.mxu0 %v2250_v15  ;;  %1386 = vmatpush.bf16.msrb.mxu1 %v2258_v28 }
 0x3d5   :  { %1399 = vmatpush.bf16.msra.mxu2 %v2261_v33  ;;  %1412 = vmatpush.bf16.msra.mxu3 %v2255_v23 }
 0x3d8   :  { %1374 = vmatpush.bf16.msra.mxu0 %v2264_v34  ;;  %1387 = vmatpush.bf16.msrb.mxu1 %v2291_v59  ;;  %v2737_v34 = vld [vmem:[#allocation22_spill] sm:$0xff] }
 0x3d9   :  { %1400 = vmatpush.bf16.msra.mxu2 %v2271_v42  ;;  %1413 = vmatpush.bf16.msra.mxu3 %v2267_v41 }
 0x3dc   :  { %1375 = vmatpush.bf16.msra.mxu0 %v2274_v47  ;;  %1388 = vmatpush.bf16.msrb.mxu1 %v2296_v2 }
 0x3dd   :  { %1401 = vmatpush.bf16.msra.mxu2 %v2283_v55  ;;  %1414 = vmatpush.bf16.msra.mxu3 %v2280_v52 }
 0x43b   :  { %v1123_v18 = vpop.f32.mrf.mxu0  ;;  %v1136_v19 = vpop.f32.mrf.mxu1 }
 0x43c   :  { %v1166_v27 = vadd.f32 %v1123_v18, %v2734_v26  ;;  %v1167_v32 = vadd.f32 %v1136_v19, %v2735_v30  ;;  %v2738_v19 = vld [vmem:[#allocation13_spill] sm:$0xff] }
 0x43e   :  { %v1786_v36 = vmul.f32 -1.442695, %v1166_v27  ;;  %v1787_v39 = vmul.f32 -1.442695, %v1167_v32  ;;  %v2739_v27 = vld [vmem:[#allocation30_spill] sm:$0xff] }
 0x440   :  { %1965 = vpow2.f32 %v1786_v36 }
 0x441   :  { %1967 = vpow2.f32 %v1787_v39 }
 0x442   :  { %v1149_v43 = vpop.f32.mrf.mxu2  ;;  %v1162_v44 = vpop.f32.mrf.mxu3 }
 0x443   :  { %v1169_v53 = vadd.f32 %v1162_v44, %v2736_v50  ;;  %v1125_v54 = vpop.f32.mrf.mxu0  ;;  %v1138_v57 = vpop.f32.mrf.mxu1  ;;  %v1168_v41 = vadd.f32 %v1149_v43, %v2737_v34  ;;  %v2740_v44 = vld [vmem:[#allocation26_spill] sm:$0xff] }
 0x445   :  { %v1788_v63 = vmul.f32 -1.442695, %v1169_v53 }
 0x446   :  { %v1966_v0 = vpop.eup %1965 }
 0x447   :  { %v1968_v1 = vpop.eup %1967  ;;  %v1173_v13 = vadd.f32 1.0, %v1966_v0  ;;  %1969 = vpow2.f32 %v1788_v63 }
 0x448   :  { %v1192_v14 = vadd.f32 1.0, %v1968_v1 }
 0x449   :  { %1971 = vrcp.f32 %v1173_v13  ;;  %v1185_v2 = vand.u32 2147483648, %v1173_v13  ;;  %v1183_v22 = vand.u32 2147483647, %v1173_v13  ;;  %vm1179_vm15 = vweird.f32 %v1173_v13 }
 0x44a   :  { %1973 = vrcp.f32 %v1192_v14  ;;  %v1151_v15 = vpop.f32.mrf.mxu2  ;;  %v1164_v16 = vpop.f32.mrf.mxu3  ;;  %v1204_v21 = vand.u32 2147483648, %v1192_v14  ;;  %v1202_v61 = vand.u32 2147483647, %v1192_v14  ;;  %vm1198_vm0 = vweird.f32 %v1192_v14 }
 0x44b   :  { %v1186_v56 = vor.u32 1.1754944e-38, %v1185_v2  ;;  %vm1184_vm3 = vcmp.eq.f32.partialorder %v1183_v22, 8.507059e+37 }
 0x44c   :  { %v1205_v51 = vor.u32 1.1754944e-38, %v1204_v21  ;;  %vm1203_vm4 = vcmp.eq.f32.partialorder %v1202_v61, 8.507059e+37 }
 0x44d   :  { %v1970_v23 = vpop.eup %1969 }
 0x44e   :  { %v1212_v28 = vadd.f32 1.0, %v1970_v23 }
 0x44f   :  { %v1972_v33 = vpop.eup %1971 }
 0x450   :  { %v1974_v42 = vpop.eup %1973  ;;  %v1175_v47 = vmul.f32 %v1972_v33, %v1173_v13  ;;  %1975 = vrcp.f32 %v1212_v28  ;;  %vm1180_vm13 = vweird.f32 %v1972_v33  ;;  %v1224_v10 = vand.u32 2147483648, %v1212_v28 }
 0x451   :  { %v1194_v52 = vmul.f32 %v1974_v42, %v1192_v14  ;;  %1977 = vtanh.f32 %v1168_v41  ;;  %vm1199_vm14 = vweird.f32 %v1974_v42  ;;  %vm1181_vm1 = vmor %vm1179_vm15, %vm1180_vm13  ;;  %vm1218_vm6 = vweird.f32 %v1212_v28 }
 0x452   :  { %v1176_v55 = vsub.f32 1.0, %v1175_v47  ;;  %vm1200_vm2 = vmor %vm1198_vm0, %vm1199_vm14  ;;  %v1222_v48 = vand.u32 2147483647, %v1212_v28  ;;  %v1225_v38 = vor.u32 1.1754944e-38, %v1224_v10 }
 0x453   :  { %v1195_v59 = vsub.f32 1.0, %v1194_v52 }
 0x454   :  { %v1177_v9 = vmul.f32 %v1972_v33, %v1176_v55  ;;  %vm1223_vm8 = vcmp.eq.f32.partialorder %v1222_v48, 8.507059e+37 }
 0x455   :  { %v1196_v20 = vmul.f32 %v1974_v42, %v1195_v59 }
 0x456   :  { %v1976_v12 = vpop.eup %1975  ;;  %v1178_v6 = vadd.f32 %v1972_v33, %v1177_v9 }
 0x457   :  { %v1197_v40 = vadd.f32 %v1974_v42, %v1196_v20  ;;  %v1214_v7 = vmul.f32 %v1976_v12, %v1212_v28  ;;  %v1978_v29 = vpop.eup %1977  ;;  %vm1219_vm5 = vweird.f32 %v1976_v12 }
 0x458   :  { %v1182_v62 = vsel %vm1181_vm1, %v1972_v33, %v1178_v6  ;;  %vm1220_vm7 = vmor %vm1218_vm6, %vm1219_vm5  ;;  %v2741_v33 = vld [vmem:[#allocation25_spill] sm:$0xff] }
 0x459   :  { %v1187_v37 = vsel %vm1184_vm3, %v1186_v56, %v1182_v62  ;;  %v1201_v31 = vsel %vm1200_vm2, %v1974_v42, %v1197_v40  ;;  %v1215_v49 = vsub.f32 1.0, %v1214_v7 }
 0x45a   :  { %v1206_v17 = vsel %vm1203_vm4, %v1205_v51, %v1201_v31  ;;  %v1229_v11 = vmul.f32 %v1978_v29, %v1187_v37 }
 0x45b   :  { %v1228_v58 = vmul.f32 %v1206_v17, %v2637_v5  ;;  %v1216_v45 = vmul.f32 %v1976_v12, %v1215_v49 }
 0x45d   :  { %v2677_v24 = vadd.f32 %v1229_v11, %v1228_v58  ;;  %v1217_v35 = vadd.f32 %v1976_v12, %v1216_v45 }
 0x45f   :  { %1979 = vtanh.f32 %v2677_v24  ;;  %v1221_v46 = vsel %vm1220_vm7, %v1976_v12, %v1217_v35 }
 0x460   :  { %v1226_v4 = vsel %vm1223_vm8, %v1225_v38, %v1221_v46 }
 0x465   :  { %v1980_v25 = vpop.eup %1979 }
 0x466   :  { %v1232_v8 = vmul.f32 %v1980_v25, %v1226_v4 }
 0x468   :  { %v1240_v60 = vpack.c.bf16 %v1232_v8, %v1232_v8 }
 0x46a   :  { %1249 = vmatmul.bf16.vlgmr.msrb.gmra.mxu0 %v1240_v60  ;;  %1262 = vmatmul.bf16.vlgmr.msra.gmra.mxu1 %v1240_v60 }
 0x46b   :  { %1275 = vmatmul.bf16.vlgmr.msrb.gmra.mxu2 %v1240_v60  ;;  %1288 = vmatmul.bf16.vlgmr.msrb.gmra.mxu3 %v1240_v60 }
 0x4e7   :  { %v1250_v5 = vpop.f32.mrf.mxu0  ;;  %v1263_v18 = vpop.f32.mrf.mxu1 }
 0x4e8   :  { %v1293_v26 = vadd.f32 %v1250_v5, %v2738_v19  ;;  %v1294_v30 = vadd.f32 %v1263_v18, %v2739_v27  ;;  %v1873_v5 = vld [vmem:[#allocation6 + $0x30] sm:$0xff]  ;;  %v1872_v18 = vld [vmem:[#allocation6 + $0x28] sm:$0xff]  ;;  %v1871_v19 = vld [vmem:[#allocation6 + $0x20] sm:$0xff] }
 0x4e9   :  { %v2742_v27 = vld [vmem:[#allocation12_spill] sm:$0xff] }
 0x4ea   :  { %v1789_v32 = vmul.f32 -1.442695, %v1293_v26  ;;  %v1790_v36 = vmul.f32 -1.442695, %v1294_v30  ;;  %v1870_v26 = vld [vmem:[#allocation6 + $0x18] sm:$0xff] }
 0x4eb   :  { %v2743_v30 = vld [vmem:[#allocation14_spill] sm:$0xff] }
 0x4ec   :  { %1981 = vpow2.f32 %v1789_v32  ;;  %v159_v32 = vadd.f32 %v2743_v30, %v2742_v27 }
 0x4ed   :  { %1983 = vpow2.f32 %v1790_v36 }
 0x4ee   :  { %v1276_v39 = vpop.f32.mrf.mxu2  ;;  %v1289_v43 = vpop.f32.mrf.mxu3 }
 0x4ef   :  { %v1296_v50 = vadd.f32 %v1289_v43, %v2740_v44  ;;  %v1252_v53 = vpop.f32.mrf.mxu0  ;;  %v1265_v54 = vpop.f32.mrf.mxu1  ;;  %v1295_v34 = vadd.f32 %v1276_v39, %v2741_v33 }
 0x4f1   :  { %v1791_v57 = vmul.f32 -1.442695, %v1296_v50  ;;  %v1869_v50 = vld [vmem:[#allocation6 + $0x10] sm:$0xff] }
 0x4f2   :  { %v1982_v63 = vpop.eup %1981 }
 0x4f3   :  { %v1984_v0 = vpop.eup %1983  ;;  %v1300_v1 = vadd.f32 1.0, %v1982_v63  ;;  %1985 = vpow2.f32 %v1791_v57  ;;  %v1868_v57 = vld [vmem:[#allocation6 + $0x8] sm:$0xff] }
 0x4f4   :  { %v1319_v13 = vadd.f32 1.0, %v1984_v0 }
 0x4f5   :  { %1987 = vrcp.f32 %v1300_v1  ;;  %v1312_v59 = vand.u32 2147483648, %v1300_v1  ;;  %v1310_v9 = vand.u32 2147483647, %v1300_v1  ;;  %vm1306_vm11 = vweird.f32 %v1300_v1 }
 0x4f6   :  { %1989 = vrcp.f32 %v1319_v13  ;;  %v1278_v14 = vpop.f32.mrf.mxu2  ;;  %v1291_v15 = vpop.f32.mrf.mxu3  ;;  %v1331_v2 = vand.u32 2147483648, %v1319_v13  ;;  %v1329_v20 = vand.u32 2147483647, %v1319_v13  ;;  %vm1325_vm12 = vweird.f32 %v1319_v13 }
 0x4f7   :  { %v1313_v6 = vor.u32 1.1754944e-38, %v1312_v59  ;;  %vm1311_vm15 = vcmp.eq.f32.partialorder %v1310_v9, 8.507059e+37  ;;  %v2745_v59 = vld [vmem:[#allocation28_spill] sm:$0xff] }
 0x4f8   :  { %v1332_v7 = vor.u32 1.1754944e-38, %v1331_v2  ;;  %vm1330_vm0 = vcmp.eq.f32.partialorder %v1329_v20, 8.507059e+37 }
 0x4f9   :  { %v1986_v16 = vpop.eup %1985 }
 0x4fa   :  { %v1339_v23 = vadd.f32 1.0, %v1986_v16  ;;  %v1867_v16 = vld [vmem:[#allocation6] sm:$0xff] }
 0x4fb   :  { %v1988_v28 = vpop.eup %1987 }
 0x4fc   :  { %v1990_v41 = vpop.eup %1989  ;;  %v1302_v42 = vmul.f32 %v1988_v28, %v1300_v1  ;;  %1991 = vrcp.f32 %v1339_v23  ;;  %vm1307_vm9 = vweird.f32 %v1988_v28  ;;  %v1351_v10 = vand.u32 2147483648, %v1339_v23  ;;  %v2744_v1 = vld [vmem:[#allocation29_spill] sm:$0xff] }
 0x4fd   :  { %v1321_v47 = vmul.f32 %v1990_v41, %v1319_v13  ;;  %1993 = vtanh.f32 %v1295_v34  ;;  %vm1326_vm10 = vweird.f32 %v1990_v41  ;;  %vm1308_vm13 = vmor %vm1306_vm11, %vm1307_vm9  ;;  %vm1345_vm2 = vweird.f32 %v1339_v23 }
 0x4fe   :  { %v1303_v52 = vsub.f32 1.0, %v1302_v42  ;;  %vm1327_vm14 = vmor %vm1325_vm12, %vm1326_vm10  ;;  %v1349_v48 = vand.u32 2147483647, %v1339_v23  ;;  %v1352_v38 = vor.u32 1.1754944e-38, %v1351_v10 }
 0x4ff   :  { %v1322_v55 = vsub.f32 1.0, %v1321_v47 }
 0x500   :  { %v1304_v21 = vmul.f32 %v1988_v28, %v1303_v52  ;;  %vm1350_vm4 = vcmp.eq.f32.partialorder %v1349_v48, 8.507059e+37 }
 0x501   :  { %v1323_v22 = vmul.f32 %v1990_v41, %v1322_v55 }
 0x502   :  { %v1992_v61 = vpop.eup %1991  ;;  %v1305_v12 = vadd.f32 %v1988_v28, %v1304_v21 }
 0x503   :  { %v1324_v56 = vadd.f32 %v1990_v41, %v1323_v22  ;;  %v1341_v40 = vmul.f32 %v1992_v61, %v1339_v23  ;;  %v1994_v62 = vpop.eup %1993  ;;  %vm1346_vm1 = vweird.f32 %v1992_v61 }
 0x504   :  { %v1309_v51 = vsel %vm1308_vm13, %v1988_v28, %v1305_v12  ;;  %vm1347_vm3 = vmor %vm1345_vm2, %vm1346_vm1 }
 0x505   :  { %v1314_v29 = vsel %vm1311_vm15, %v1313_v6, %v1309_v51  ;;  %v1328_v37 = vsel %vm1327_vm14, %v1990_v41, %v1324_v56  ;;  %v1342_v31 = vsub.f32 1.0, %v1341_v40 }
 0x506   :  { %v1333_v49 = vsel %vm1330_vm0, %v1332_v7, %v1328_v37  ;;  %v1356_v17 = vmul.f32 %v1994_v62, %v1314_v29 }
 0x507   :  { %v1355_v11 = vmul.f32 %v1333_v49, %v2677_v24  ;;  %v1343_v58 = vmul.f32 %v1992_v61, %v1342_v31  ;;  %v1874_v24 = vld [vmem:[#allocation6 + $0x38] sm:$0xff] }
 0x508   :  { %1556 = vmatpush.bf16.msrb.mxu0 %v1874_v24 }
 0x509   :  { %v2685_v45 = vadd.f32 %v1356_v17, %v1355_v11  ;;  %v1344_v35 = vadd.f32 %v1992_v61, %v1343_v58 }
 0x50b   :  { %1995 = vtanh.f32 %v2685_v45  ;;  %v1348_v46 = vsel %vm1347_vm3, %v1992_v61, %v1344_v35 }
 0x50c   :  { %v1353_v4 = vsel %vm1350_vm4, %v1352_v38, %v1348_v46  ;;  %1557 = vmatpush.bf16.msrb.mxu0 %v1873_v5 }
 0x510   :  { %1558 = vmatpush.bf16.msrb.mxu0 %v1872_v18 }
 0x511   :  { %v1996_v25 = vpop.eup %1995 }
 0x512   :  { %v1359_v8 = vmul.f32 %v1996_v25, %v1353_v4 }
 0x514   :  { %v1367_v60 = vpack.c.bf16 %v1359_v8, %v1359_v8  ;;  %1559 = vmatpush.bf16.msrb.mxu0 %v1871_v19 }
 0x516   :  { %1376 = vmatmul.bf16.vlgmr.msra.gmra.mxu0 %v1367_v60  ;;  %1389 = vmatmul.bf16.vlgmr.msrb.gmra.mxu1 %v1367_v60 }
 0x517   :  { %1402 = vmatmul.bf16.vlgmr.msra.gmra.mxu2 %v1367_v60  ;;  %1415 = vmatmul.bf16.vlgmr.msra.gmra.mxu3 %v1367_v60 }
 0x518   :  { %1560 = vmatpush.bf16.msrb.mxu0 %v1870_v26 }
 0x51c   :  { %1561 = vmatpush.bf16.msrb.mxu0 %v1869_v50 }
 0x520   :  { %1562 = vmatpush.bf16.msrb.mxu0 %v1868_v57 }
 0x524   :  { %1563 = vmatpush.bf16.msrb.mxu0 %v1867_v16 }
 0x593   :  { %v1377_v36 = vpop.f32.mrf.mxu0  ;;  %v1390_v39 = vpop.f32.mrf.mxu1 }
 0x594   :  { %v1420_v43 = vadd.f32 %v1377_v36, %v159_v32  ;;  %v1421_v44 = vadd.f32 %v1390_v39, %v2473_v3 }
 0x596   :  { %v1792_v53 = vmul.f32 -1.442695, %v1420_v43  ;;  %v1793_v54 = vmul.f32 -1.442695, %v1421_v44 }
 0x598   :  { %1997 = vpow2.f32 %v1792_v53 }
 0x599   :  { %1999 = vpow2.f32 %v1793_v54 }
 0x59a   :  { %v1403_v63 = vpop.f32.mrf.mxu2  ;;  %v1416_v0 = vpop.f32.mrf.mxu3 }
 0x59b   :  { %v1423_v13 = vadd.f32 %v1416_v0, %v2744_v1  ;;  %v1379_v14 = vpop.f32.mrf.mxu0  ;;  %v1392_v15 = vpop.f32.mrf.mxu1  ;;  %v1422_v2 = vadd.f32 %v1403_v63, %v2745_v59 }
 0x59d   :  { %v1794_v23 = vmul.f32 -1.442695, %v1423_v13 }
 0x59e   :  { %v1998_v28 = vpop.eup %1997 }
 0x59f   :  { %v2000_v33 = vpop.eup %1999  ;;  %v1427_v34 = vadd.f32 1.0, %v1998_v28  ;;  %2001 = vpow2.f32 %v1794_v23 }
 0x5a0   :  { %v1446_v3 = vadd.f32 1.0, %v2000_v33 }
 0x5a1   :  { %2003 = vrcp.f32 %v1427_v34  ;;  %v1439_v12 = vand.u32 2147483648, %v1427_v34  ;;  %v1437_v40 = vand.u32 2147483647, %v1427_v34  ;;  %vm1433_vm7 = vweird.f32 %v1427_v34 }
 0x5a2   :  { %2005 = vrcp.f32 %v1446_v3  ;;  %v1405_v41 = vpop.f32.mrf.mxu2  ;;  %v1418_v42 = vpop.f32.mrf.mxu3  ;;  %v1458_v6 = vand.u32 2147483648, %v1446_v3  ;;  %v1456_v51 = vand.u32 2147483647, %v1446_v3  ;;  %vm1452_vm8 = vweird.f32 %v1446_v3 }
 0x5a3   :  { %v1440_v37 = vor.u32 1.1754944e-38, %v1439_v12  ;;  %vm1438_vm11 = vcmp.eq.f32.partialorder %v1437_v40, 8.507059e+37 }
 0x5a4   :  { %v1459_v17 = vor.u32 1.1754944e-38, %v1458_v6  ;;  %vm1457_vm12 = vcmp.eq.f32.partialorder %v1456_v51, 8.507059e+37 }
 0x5a5   :  { %v2002_v47 = vpop.eup %2001 }
 0x5a6   :  { %v1466_v52 = vadd.f32 1.0, %v2002_v47 }
 0x5a7   :  { %v2004_v55 = vpop.eup %2003 }
 0x5a8   :  { %v2006_v21 = vpop.eup %2005  ;;  %v1429_v9 = vmul.f32 %v2004_v55, %v1427_v34  ;;  %2007 = vrcp.f32 %v1466_v52  ;;  %vm1434_vm5 = vweird.f32 %v2004_v55  ;;  %v1478_v24 = vand.u32 2147483648, %v1466_v52 }
 0x5a9   :  { %v1448_v22 = vmul.f32 %v2006_v21, %v1446_v3  ;;  %2009 = vtanh.f32 %v1422_v2  ;;  %vm1453_vm6 = vweird.f32 %v2006_v21  ;;  %vm1435_vm9 = vmor %vm1433_vm7, %vm1434_vm5  ;;  %vm1472_vm14 = vweird.f32 %v1466_v52 }
 0x5aa   :  { %v1430_v20 = vsub.f32 1.0, %v1429_v9  ;;  %vm1454_vm10 = vmor %vm1452_vm8, %vm1453_vm6  ;;  %v1476_v5 = vand.u32 2147483647, %v1466_v52  ;;  %v1479_v19 = vor.u32 1.1754944e-38, %v1478_v24 }
 0x5ab   :  { %v1449_v61 = vsub.f32 1.0, %v1448_v22 }
 0x5ac   :  { %v1431_v56 = vmul.f32 %v2004_v55, %v1430_v20  ;;  %vm1477_vm0 = vcmp.eq.f32.partialorder %v1476_v5, 8.507059e+37 }
 0x5ad   :  { %v1450_v7 = vmul.f32 %v2006_v21, %v1449_v61 }
 0x5ae   :  { %v2008_v62 = vpop.eup %2007  ;;  %v1432_v29 = vadd.f32 %v2004_v55, %v1431_v56 }
 0x5af   :  { %v1451_v31 = vadd.f32 %v2006_v21, %v1450_v7  ;;  %v1468_v49 = vmul.f32 %v2008_v62, %v1466_v52  ;;  %v2010_v58 = vpop.eup %2009  ;;  %vm1473_vm13 = vweird.f32 %v2008_v62 }
 0x5b0   :  { %v1436_v11 = vsel %vm1435_vm9, %v2004_v55, %v1432_v29  ;;  %vm1474_vm15 = vmor %vm1472_vm14, %vm1473_vm13 }
 0x5b1   :  { %v1441_v35 = vsel %vm1438_vm11, %v1440_v37, %v1436_v11  ;;  %v1455_v10 = vsel %vm1454_vm10, %v2006_v21, %v1451_v31  ;;  %v1469_v48 = vsub.f32 1.0, %v1468_v49 }
 0x5b2   :  { %v1460_v46 = vsel %vm1457_vm12, %v1459_v17, %v1455_v10  ;;  %v1483_v38 = vmul.f32 %v2010_v58, %v1441_v35 }
 0x5b3   :  { %v1482_v25 = vmul.f32 %v1460_v46, %v2685_v45  ;;  %v1470_v4 = vmul.f32 %v2008_v62, %v1469_v48  ;;  %v1884_v45 = vld [vmem:[%s2705_s5] ss:$0 sm:$0xff] }
 0x5b5   :  { %v1484_v8 = vadd.f32 %v1483_v38, %v1482_v25  ;;  %v1471_v60 = vadd.f32 %v2008_v62, %v1470_v4 }
 0x5b7   :  { %2011 = vtanh.f32 %v1484_v8  ;;  %v1475_v18 = vsel %vm1474_vm15, %v2008_v62, %v1471_v60 }
 0x5b8   :  { %v1480_v27 = vsel %vm1477_vm0, %v1479_v19, %v1475_v18 }
 0x5bd   :  { %v2012_v26 = vpop.eup %2011 }
 0x5be   :  { %v1486_v30 = vmul.f32 %v2012_v26, %v1480_v27 }
 0x5c0   :  { %v1487_v32 = vpack.c.bf16 %v1486_v30, %v1486_v30 }
 0x5c2   :  { %1564 = vmatmul.bf16.vlgmr.msrb.gmra.mxu0 %v1487_v32 }
 0x63f   :  { %v1565_v36 = vpop.f32.mrf.mxu0 }
 0x640   :  { %v1566_v39 = vadd.f32 %v1884_v45, %v1565_v36 }
 0x642   :  { %1569 = vst [vmem:[#allocation8] sm:$0xff] %v1566_v39 }
 0x643   :  { %1580 = dma.vmem_to_hbm [thread:$0]  %s1576_s2, 128, %s1578_s4, [#allocation5]  }
 0x647   :  { %v1567_v43 = vpop.f32.mrf.mxu0 }
 0x648   :  { %2089 = dma.done.wait [#allocation5], 128  }
 0x649   :  { %2090 = vsyncadd [#allocation5], 4294967168 }
 0x64a   :  { %1585 = vsyncpa [#allocation4], 1 }
 0x64b   :  { %1586 = vsyncpa [#allocation7], 1 }
 0x64c   :  { %1587 = vsyncpa [#allocation5], 1 }

</bundles_post_ra>
